<compile_context>
chip_gen: v7x
topology: tpu7x:2x2x1
jax: 0.10.0
libtpu: 0.0.40
codegen_flags: <defaults>
</compile_context>

<pallas_src>
import functools

import jax
import jax.numpy as jnp
from jax.experimental import pallas as pl
from jax.experimental.pallas import tpu as pltpu


def _soft_label_smoothing_kernel(pred_ref, target_ref, out_ref, *,
                                 smoothing: float, classes: int,
                                 total_rows: int, block_rows: int,
                                 steps_per_split: int, needs_mask: bool):
    c = pl.program_id(0)   # TensorCore split ("parallel")
    i = pl.program_id(1)   # row-tile step within the split ("arbitrary")

    # Per-split partial accumulator lives in this split's (8,128) output block, which
    # stays resident across the inner "arbitrary" axis (out index_map is constant in i).
    @pl.when(i == 0)
    def _():
        out_ref[...] = jnp.zeros_like(out_ref)

    x = pred_ref[...].astype(jnp.float32)      # (br, C)
    t = target_ref[...].astype(jnp.float32)    # (br, C)

    # Lane-axis sums are routed through the (otherwise idle) MXU via ones-vector dots.
    # HIGHEST precision keeps the f32 accuracy of the reference (default would round the
    # operands to bf16).  Only the per-row max remains on the XLU.
    ones = jnp.ones((classes, 1), jnp.float32)
    hi = jax.lax.Precision.HIGHEST

    m = jnp.max(x, axis=-1, keepdims=True)                                    # (br,1) XLU
    sum_e = jnp.dot(jnp.exp(x - m), ones,
                    preferred_element_type=jnp.float32, precision=hi)         # (br,1) MXU
    nlogz = m + jnp.log(sum_e)                                                # (br,1)

    # Per-element stable form:  L = -log_softmax(x) = (m + lse) - x
    #   row_loss = sum(true_dist * L) = (1-s) * sum(t*L) + (s/C) * sum(L)
    L = nlogz - x                                                             # (br, C)
    sum_tL = jnp.dot(t * L, ones, preferred_element_type=jnp.float32,
                     precision=hi)                                            # (br,1) MXU
    sum_L = jnp.dot(L, ones, preferred_element_type=jnp.float32,
                    precision=hi)                                             # (br,1) MXU
    row_loss = (1.0 - smoothing) * sum_tL + (smoothing / classes) * sum_L     # (br,1)

    if needs_mask:
        # Mask rows past N: covers both the padded tail of the last real block and any
        # clamped duplicate blocks of this split.  jnp.where is a true select, so NaN/Inf
        # produced by unspecified padded data never pollutes the sum.
        gstep = c * steps_per_split + i
        row_idx = gstep * block_rows + jax.lax.broadcasted_iota(
            jnp.int32, row_loss.shape, 0)
        row_loss = jnp.where(row_idx < total_rows, row_loss, 0.0)

    # Fold to a scalar and broadcast-add into the whole (8,128) block (one vreg RMW per
    # step; no (br,1) accumulator and no extra per-step vst traffic).
    out_ref[...] += jnp.sum(row_loss)


def soft_label_smoothing_loss(pred, target, *, classes, smoothing=0.1,
                              block_rows=None, num_splits=2):
    """pred, target: (..., C) float arrays. Returns scalar float32 loss (mean over rows)."""
    C = pred.shape[-1]
    assert classes == C
    assert target.shape == pred.shape
    pred2 = pred.reshape(-1, C)
    target2 = target.reshape(-1, C)
    N = pred2.shape[0]

    itemsize = jnp.dtype(pred2.dtype).itemsize
    sub = 16 if itemsize == 2 else 8          # sublane tiling (bf16 packs 16 rows/vreg)

    # Generation-aware VMEM capacity (v5e/v6e: 128 MiB, v7x: 64 MiB); conservative fallback.
    try:
        vmem_cap = int(getattr(pltpu.get_tpu_info(), "vmem_capacity_bytes",
                               64 * 1024 * 1024))
    except Exception:  # interpret mode / older runtimes
        vmem_cap = 64 * 1024 * 1024

    # Working-set model per row of tile: double-buffered inputs + ~6 live f32 (br,C) temps
    # (x, t, x-m/exp, L, t*L, slack) that Mosaic materializes in VMEM at these tile sizes.
    per_row_inputs = 2 * C * itemsize
    per_row_working = 2 * per_row_inputs + 6 * C * 4
    vmem_budget = min(vmem_cap // 2, 48 * 1024 * 1024)

    # Row tile: target >= ~4 MiB of input per grid step (per-step pipeline overhead is
    # ~0.35 us, so this keeps us near the HBM roofline), capped by the VMEM budget and N.
    target_step_bytes = 4 * 1024 * 1024
    if block_rows is None:
        br = target_step_bytes // per_row_inputs
    else:
        br = int(block_rows)
    br = min(br, max(sub, vmem_budget // per_row_working))
    br = min(br, pl.cdiv(N, sub) * sub)
    br = max(sub, (br // sub) * sub)

    steps_total = pl.cdiv(N, br)
    nsplit = max(1, int(num_splits))          # 2 -> both TensorCores on v7x; harmless on 1-TC chips
    spp = pl.cdiv(steps_total, nsplit)        # row-tile steps per split
    needs_mask = (nsplit * spp * br != N)

    vmem_need = 2 * (2 * br * C * itemsize) + 6 * br * C * 4
    vmem_limit = int(min(max(vmem_need + 16 * 1024 * 1024, 24 * 1024 * 1024),
                         max(vmem_cap - 8 * 1024 * 1024, 24 * 1024 * 1024)))

    kernel = functools.partial(
        _soft_label_smoothing_kernel,
        smoothing=float(smoothing), classes=int(classes),
        total_rows=int(N), block_rows=int(br),
        steps_per_split=int(spp), needs_mask=bool(needs_mask))

    def in_map(c, i):
        # Clamp so a split's trailing (duplicate) steps never DMA out of bounds; their
        # rows are masked out inside the kernel.
        return (jnp.minimum(c * spp + i, steps_total - 1), 0)

    out = pl.pallas_call(
        kernel,
        out_shape=jax.ShapeDtypeStruct((nsplit * 8, 128), jnp.float32),
        grid_spec=pltpu.PrefetchScalarGridSpec(
            num_scalar_prefetch=0,
            grid=(nsplit, spp),
            in_specs=[
                pl.BlockSpec((br, C), in_map),
                pl.BlockSpec((br, C), in_map),
            ],
            out_specs=pl.BlockSpec((8, 128), lambda c, i: (c, 0)),
        ),
        compiler_params=pltpu.CompilerParams(
            dimension_semantics=("parallel", "arbitrary"),
            vmem_limit_bytes=vmem_limit),
    )(pred2, target2)

    # Each split's partial sum is broadcast across its (8,128) block; read one element
    # per split and finish the mean in JAX.
    partials = out.reshape(nsplit, 8, 128)[:, 0, 0]
    return jnp.sum(partials) / jnp.float32(N)


def _reference(pred, target, *, classes, smoothing=0.1):
    logp = jax.nn.log_softmax(pred.astype(jnp.float32), axis=-1)
    true_dist = target.astype(jnp.float32) * (1.0 - smoothing) + smoothing / classes
    return jnp.mean(jnp.sum(-true_dist * logp, axis=-1))


if __name__ == "__main__":
    # Small shapes consistent with the module: N rows, C = classes.
    # N=100 deliberately not a multiple of any tile to exercise tail masking.
    N, C = 100, 128
    smoothing = 0.1

    key = jax.random.PRNGKey(0)
    kp, kt = jax.random.split(key)
    pred = jax.random.normal(kp, (N, C), dtype=jnp.float32)
    # Soft targets: a probability distribution per row (module accepts any soft labels).
    target_logits = jax.random.normal(kt, (N, C), dtype=jnp.float32)
    target = jax.nn.softmax(target_logits, axis=-1)

    ref = _reference(pred, target, classes=C, smoothing=smoothing)

    # 1) Default (large) tile: single real block, clamped duplicate on split 1, tail masked.
    loss = soft_label_smoothing_loss(pred, target, classes=C, smoothing=smoothing)
    loss = jax.block_until_ready(loss)
    assert jnp.allclose(loss, ref, rtol=2e-5, atol=2e-5), (loss, ref)

    # 2) Small tile: multi-step accumulation per split + masked final block.
    loss2 = soft_label_smoothing_loss(pred, target, classes=C,
                                      smoothing=smoothing, block_rows=32)
    loss2 = jax.block_until_ready(loss2)
    assert jnp.allclose(loss2, ref, rtol=2e-5, atol=2e-5), (loss2, ref)

    print("KERNEL_OK")
</pallas_src>

<mosaic_0001>
module attributes {stable_mosaic.version = 11 : i64} {
  func.func @_soft_label_smoothing_kernel(%arg0: i32, %arg1: i32, %arg2: memref<104x128xf32, #tpu.memory_space<vmem>>, %arg3: memref<104x128xf32, #tpu.memory_space<vmem>>, %arg4: memref<8x128xf32, #tpu.memory_space<vmem>>) attributes {dimension_semantics = [#tpu.dimension_semantics<parallel>, #tpu.dimension_semantics<arbitrary>], iteration_bounds = array<i64: 2, 1>, scalar_prefetch = 0 : i64, scratch_operands = 0 : i64, tpu.core_type = #tpu.core_type<tc>, window_params = [{transform_indices = @transform_0, window_bounds = array<i64: 104, 128>}, {transform_indices = @transform_1, window_bounds = array<i64: 104, 128>}, {transform_indices = @transform_2, window_bounds = array<i64: 8, 128>}]} {
    %c0_i32 = arith.constant 0 : i32
    %0 = arith.cmpi eq, %arg1, %c0_i32 : i32
    %1 = arith.extui %0 : i1 to i32
    %c0_i32_0 = arith.constant 0 : i32
    %2 = arith.cmpi ne, %1, %c0_i32_0 : i32
    scf.if %2 {
      %cst_16 = arith.constant 0.000000e+00 : f32
      %42 = vector.broadcast %cst_16 : f32 to vector<8x128xf32>
      %c0_17 = arith.constant 0 : index
      %c0_18 = arith.constant 0 : index
      %43 = vector.load %arg4[%c0_17, %c0_18] : memref<8x128xf32, #tpu.memory_space<vmem>>, vector<8x128xf32>
      tpu.vector_store %arg4[%c0_17, %c0_18], %42 {strides = array<i32>} : memref<8x128xf32, #tpu.memory_space<vmem>>, vector<8x128xf32>,
    } else {
    }
    %c0 = arith.constant 0 : index
    %c0_1 = arith.constant 0 : index
    %3 = vector.load %arg2[%c0, %c0_1] : memref<104x128xf32, #tpu.memory_space<vmem>>, vector<104x128xf32>
    %c0_2 = arith.constant 0 : index
    %c0_3 = arith.constant 0 : index
    %4 = vector.load %arg3[%c0_2, %c0_3] : memref<104x128xf32, #tpu.memory_space<vmem>>, vector<104x128xf32>
    %cst = arith.constant 1.000000e+00 : f32
    %5 = vector.broadcast %cst : f32 to vector<128x1xf32>
    %cst_4 = arith.constant dense<0xFF800000> : vector<104xf32>
    %6 = vector.multi_reduction <maximumf>, %3, %cst_4 [1] : vector<104x128xf32> to vector<104xf32>
    %7 = vector.shape_cast %6 : vector<104xf32> to vector<104x1xf32>
    %8 = vector.broadcast %7 : vector<104x1xf32> to vector<104x128xf32>
    %9 = arith.subf %3, %8 : vector<104x128xf32>
    %10 = math.exp %9 : vector<104x128xf32>
    %cst_5 = arith.constant dense<0.000000e+00> : vector<104x1xf32>
    %11 = tpu.matmul %10, %5, %cst_5 {dimension_numbers = #tpu.dot_dimension_numbers<[1], [0], [0], [1], [0, 0, 1, 1], [], []>, precision = #tpu.contract_precision<fp32>} : vector<104x128xf32>, vector<128x1xf32>, vector<104x1xf32> -> vector<104x1xf32>
    %12 = math.log %11 : vector<104x1xf32>
    %13 = arith.addf %7, %12 : vector<104x1xf32>
    %14 = vector.broadcast %13 : vector<104x1xf32> to vector<104x128xf32>
    %15 = arith.subf %14, %3 : vector<104x128xf32>
    %16 = arith.mulf %4, %15 : vector<104x128xf32>
    %cst_6 = arith.constant dense<0.000000e+00> : vector<104x1xf32>
    %17 = tpu.matmul %16, %5, %cst_6 {dimension_numbers = #tpu.dot_dimension_numbers<[1], [0], [0], [1], [0, 0, 1, 1], [], []>, precision = #tpu.contract_precision<fp32>} : vector<104x128xf32>, vector<128x1xf32>, vector<104x1xf32> -> vector<104x1xf32>
    %cst_7 = arith.constant dense<0.000000e+00> : vector<104x1xf32>
    %18 = tpu.matmul %15, %5, %cst_7 {dimension_numbers = #tpu.dot_dimension_numbers<[1], [0], [0], [1], [0, 0, 1, 1], [], []>, precision = #tpu.contract_precision<fp32>} : vector<104x128xf32>, vector<128x1xf32>, vector<104x1xf32> -> vector<104x1xf32>
    %cst_8 = arith.constant 0.899999976 : f32
    %19 = vector.broadcast %cst_8 : f32 to vector<104x1xf32>
    %20 = arith.mulf %19, %17 : vector<104x1xf32>
    %cst_9 = arith.constant 7.812500e-04 : f32
    %21 = vector.broadcast %cst_9 : f32 to vector<104x1xf32>
    %22 = arith.mulf %21, %18 : vector<104x1xf32>
    %23 = arith.addf %20, %22 : vector<104x1xf32>
    %c1_i32 = arith.constant 1 : i32
    %24 = arith.muli %arg0, %c1_i32 : i32
    %25 = arith.addi %24, %arg1 : i32
    %c104_i32 = arith.constant 104 : i32
    %26 = arith.muli %25, %c104_i32 : i32
    %27 = tpu.iota {dimensions = array<i32: 0>} : vector<104x1xi32>
    %28 = vector.broadcast %26 : i32 to vector<104x1xi32>
    %29 = arith.addi %28, %27 : vector<104x1xi32>
    %c100_i32 = arith.constant 100 : i32
    %30 = vector.broadcast %c100_i32 : i32 to vector<104x1xi32>
    %31 = arith.cmpi slt, %29, %30 : vector<104x1xi32>
    %cst_10 = arith.constant 0.000000e+00 : f32
    %32 = vector.broadcast %cst_10 : f32 to vector<104x1xf32>
    %33 = arith.select %31, %23, %32 : vector<104x1xi1>, vector<104x1xf32>
    %c0_11 = arith.constant 0 : index
    %c0_12 = arith.constant 0 : index
    %34 = vector.load %arg4[%c0_11, %c0_12] : memref<8x128xf32, #tpu.memory_space<vmem>>, vector<8x128xf32>
    %35 = vector.shape_cast %33 : vector<104x1xf32> to vector<1x104x1xf32>
    %cst_13 = arith.constant dense<0.000000e+00> : vector<1xf32>
    %36 = vector.multi_reduction <add>, %35, %cst_13 [1, 2] : vector<1x104x1xf32> to vector<1xf32>
    %37 = vector.shape_cast %36 : vector<1xf32> to vector<1x1x1xf32>
    %38 = vector.extract %37[0, 0, 0] : f32 from vector<1x1x1xf32>
    %39 = vector.broadcast %38 : f32 to vector<8x128xf32>
    %40 = arith.addf %34, %39 : vector<8x128xf32>
    %c0_14 = arith.constant 0 : index
    %c0_15 = arith.constant 0 : index
    %41 = vector.load %arg4[%c0_14, %c0_15] : memref<8x128xf32, #tpu.memory_space<vmem>>, vector<8x128xf32>
    tpu.vector_store %arg4[%c0_14, %c0_15], %40 {strides = array<i32>} : memref<8x128xf32, #tpu.memory_space<vmem>>, vector<8x128xf32>,
    return
  }
  func.func @transform_0(%arg0: i32, %arg1: i32) -> (i32, i32) {
    %c1_i32 = arith.constant 1 : i32
    %0 = arith.muli %arg0, %c1_i32 : i32
    %1 = arith.addi %0, %arg1 : i32
    %c0_i32 = arith.constant 0 : i32
    %2 = arith.minsi %1, %c0_i32 : i32
    %c0_i32_0 = arith.constant 0 : i32
    %c0_i32_1 = arith.constant 0 : i32
    return %2, %c0_i32_0 : i32, i32
  }
  func.func @transform_1(%arg0: i32, %arg1: i32) -> (i32, i32) {
    %c1_i32 = arith.constant 1 : i32
    %0 = arith.muli %arg0, %c1_i32 : i32
    %1 = arith.addi %0, %arg1 : i32
    %c0_i32 = arith.constant 0 : i32
    %2 = arith.minsi %1, %c0_i32 : i32
    %c0_i32_0 = arith.constant 0 : i32
    %c0_i32_1 = arith.constant 0 : i32
    return %2, %c0_i32_0 : i32, i32
  }
  func.func @transform_2(%arg0: i32, %arg1: i32) -> (i32, i32) {
    %c0_i32 = arith.constant 0 : i32
    %c0_i32_0 = arith.constant 0 : i32
    return %arg0, %c0_i32 : i32, i32
  }
}

</mosaic_0001>

<bundles_post_ra>
// kernel: tpu_custom_call.1
= control target key start
LH: loop header
LB: loop body
LE: loop exit
PB: predicated region body
PF: predicated region fallthrough
CT: control target
= control target key end

     0   :  { %7 = vsyncpa [#allocation3], 0  ;;  %s7451_s0 = inlined_call_operand.hbm [shape: f32[100,128], index: 0, kind: input, shape index: {}]   ;;  %s7452_s1 = inlined_call_operand.hbm [shape: f32[100,128], index: 1, kind: input, shape index: {}]   ;;  %s7453_s2 = inlined_call_operand.hbm [shape: f32[16,128], index: 2, kind: output, shape index: {}]  }
   0x1   :  { %9 = vsyncpa [#allocation3 + $0x1], 0 }
   0x2   :  { %10 = vsyncpa [#allocation6], 0 }
   0x3   :  { %12 = vsyncpa [#allocation6 + $0x1], 0 }
   0x4   :  { %13 = vsyncpa [#allocation4], 0 }
   0x5   :  { %15 = vsyncpa [#allocation4 + $0x1], 0  ;;  %s5854_s9 = smov 0   ;;  %s5856_s10 = smov 0  }
   0x6   :  { %s5858_s11 = smov 0   ;;  %s5860_s12 = smov 0  }
   0x7   :  { %s5862_s13 = smov 0   ;;  %s5864_s14 = smov 0  }
   0x8   :  { %s5866_s15 = smov 0   ;;  %s5868_s16 = smov 0  }
   0x9 LB: > { %s3562_s17 = sadd.s32 4294967295, %s5827_s16   ;;  %s3563_s18 = sadd.s32 4294967294, %s5827_s16   ;;  %s5827_s16 = sphi %s5868_s16, %s21_s16   ;;  %s5823_s15 = sphi %s5866_s15, %s7521_s15   ;;  %s5819_s14 = sphi %s5864_s14, %s7520_s14   ;;  %s5815_s13 = sphi %s5862_s13, %s7441_s13   ;;  %s5811_s12 = sphi %s5860_s12, %s7519_s12   ;;  %s5807_s11 = sphi %s5858_s11, %s7518_s11   ;;  %s5803_s10 = sphi %s5856_s10, %s7517_s10   ;;  %s5799_s9 = sphi %s5854_s9, %s7516_s9  }
   0xa   : > { %s33_s19 = sadd.s32 1, %s5823_s15  ;;  %p5796_p1 = scmp.ne.s32.totalorder %s5815_s13, 0 }
   0xb   : > { %p35_p0 = scmp.ge.s32.totalorder %s33_s19, 2  ;;  %p54_p2 = scmp.eq.s32.totalorder %s5827_s16, 0 }
   0xc   : > { %p59_p3 = scmp.ne.s32.totalorder %s5815_s13, %s5811_s12  ;;  %p60_p5 = scmp.eq.s32.totalorder %s3562_s17, 0 }
   0xd   : > { %s7523_s19 = smov (%p35_p0, %s33_s19), 0  ;;  %p5900_p4 = por %p5796_p1, %p54_p2 }
   0xe   : > { %p5904_p6 = por %p60_p5, %p59_p3  ;;  %s101_s22 = ssub.s32 %s5823_s15, %s7523_s19 }
   0xf   : > { %p102_p7 = scmp.eq.s32.totalorder %s101_s22, 0  ;;  %s104_s23 = sadd.s32 1, %s5807_s11 }
  0x10   : > { %s7482_s21 = scalar_select %p5904_p6, 1, 0 }
  0x11   : > { %s5912_s24 = scalar_select %p102_p7, %s5807_s11, %s104_s23  }
  0x12   : > { %p114_p8 = scmp.ne.s32.totalorder %s5807_s11, %s5803_s10  ;;  %p115_p9 = scmp.eq.s32.totalorder %s3562_s17, 1 }
  0x13   : > { %p120_p10 = scmp.ne.s32.totalorder %s5803_s10, %s5799_s9  ;;  %p121_p11 = scmp.eq.s32.totalorder %s3563_s18, 1 }
  0x14   : > { %p5918_p12 = por %p115_p9, %p114_p8  ;;  %p5512_p1 = scmp.lt.s32.totalorder %s5827_s16, 2 }
  0x15   : > { %p5923_p0 = por %p121_p11, %p120_p10  ;;  %s5829_s28 = smov [#allocation2]  }
  0x16   : > { %s7483_s25 = scalar_select %p5918_p12, 1, 0 }
  0x17   : > { %s7484_s26 = scalar_select %p5923_p0, 1, 0 }
  0x18   : > { %p5930_p2 = pnand %p5512_p1, %p5900_p4  ;;  %s155_s29 = sshll.u32 %s5829_s28, 4  ;;  %s156_s29 = int_to_ptr.vmem [resolvable:$true] %s155_s29 }
  0x19   : > { %s5660_s4 = scalar_lea.hbm %s7451_s0, 1664 }
  0x1a   : > { %p5661_p3 = scmp.ne.s32.totalorder %s7451_s0, %s5660_s4  ;;  %p5662_p5 = pneg %p5930_p2 }
  0x1b   : > { %p5667_p8 = scmp.lt.u32.totalorder %s5660_s4, %s5660_s4  ;;  %p5669_p9 = scmp.lt.u32.totalorder %s5660_s4, %s7451_s0 }
  0x1c   : > { %p5663_p4 = pnand %p5662_p5, %p5661_p3 }
  0x1d   : > { %p5670_p10 = por %p5669_p9, %p5667_p8 }
  0x1e   : > { %p5664_p7 = pneg %p5663_p4 }
  0x20   : > { %p5671_p11 = pnand %p5670_p10, %p5664_p7 }
  0x22   : > { %5674 = shalt.err (!%p5671_p11)
}
  0x23   : > { %s5675_s12 = scalar_lea.vmem %s156_s29, 1664  ;;  %s5682_s17 = scalar_lea.vmem %s156_s29, 3328 }
  0x24   : > { %p5676_p1 = scmp.ne.s32.totalorder %s156_s29, %s5675_s12  ;;  %p5683_p12 = scmp.lt.s32.totalorder %s156_s29, %s156_s29 }
  0x25   : > { %p5684_p6 = scmp.lt.s32.totalorder %s5682_s17, %s5675_s12 }
  0x26   : > { %p5678_p13 = pnand %p5676_p1, %p5662_p5 }
  0x27   : > { %p5685_p3 = por %p5684_p6, %p5683_p12 }
  0x28   : > { %p5679_p0 = pneg %p5678_p13 }
  0x2a   : > { %p5686_p4 = pnand %p5685_p3, %p5679_p0 }
  0x2c   : > { %5689 = shalt.err (!%p5686_p4)
}
  0x2d   : > { %s5830_s18 = smov 128   ;;  %s5831_s20 = smov 8  }
  0x2e   : > { %5504 = dma.hbm_to_vmem [thread:$0]  (!%p5930_p2), %s7451_s0, 1664, %s156_s29, [#allocation3], %s5830_s18, %s5830_s18, %s5831_s20  }
  0x2f   : > { %p3568_p13 = scmp.ge.s32.totalorder %s5827_s16, 1  ;;  %p187_p7 = scmp.lt.s32.totalorder %s5827_s16, 3 }
  0x30   : > { %s5832_s30 = smov [#allocation5]   ;;  %s5690_s6 = scalar_lea.hbm %s7452_s1, 1664 }
  0x31   : > { %p5961_p8 = pnand %p3568_p13, %p187_p7  ;;  %s179_s3 = sshll.u32 %s5832_s30, 4  ;;  %s180_s3 = int_to_ptr.vmem [resolvable:$true] %s179_s3 }
  0x32   : > { %p5691_p6 = scmp.ne.s32.totalorder %s7452_s1, %s5690_s6  ;;  %p5697_p9 = scmp.lt.u32.totalorder %s5690_s6, %s5690_s6 }
  0x33   : > { %s7486_s28 = scalar_select %p5961_p8, 1, 0 }
  0x34   : > { %p5693_p12 = pnand %p5691_p6, %p5662_p5  ;;  %p5699_p10 = scmp.lt.u32.totalorder %s5690_s6, %s7452_s1 }
  0x36   : > { %p5694_p0 = pneg %p5693_p12  ;;  %p5700_p11 = por %p5699_p10, %p5697_p9 }
  0x38   : > { %p5701_p1 = pnand %p5700_p11, %p5694_p0 }
  0x3a   : > { %5704 = shalt.err (!%p5701_p1)
}
  0x3b   : > { %s5705_s17 = scalar_lea.vmem %s180_s3, 1664  ;;  %s5712_s22 = scalar_lea.vmem %s180_s3, 3328 }
  0x3c   : > { %p5706_p3 = scmp.ne.s32.totalorder %s180_s3, %s5705_s17  ;;  %p5713_p7 = scmp.lt.s32.totalorder %s180_s3, %s180_s3 }
  0x3d   : > { %p5714_p8 = scmp.lt.s32.totalorder %s5712_s22, %s5705_s17 }
  0x3e   : > { %p5708_p4 = pnand %p5706_p3, %p5662_p5 }
  0x3f   : > { %p5715_p6 = por %p5714_p8, %p5713_p7 }
  0x40   : > { %p5709_p13 = pneg %p5708_p4 }
  0x42   : > { %p5716_p12 = pnand %p5715_p6, %p5709_p13 }
  0x44   : > { %5719 = shalt.err (!%p5716_p12)
}
  0x45   : > { %5507 = dma.hbm_to_vmem [thread:$0]  (!%p5930_p2), %s7452_s1, 1664, %s180_s3, [#allocation6], %s5830_s18, %s5830_s18, %s5831_s20  }
  0x46   : > { %p7487_p0 = scmp.ne.s32.totalorder %s7486_s28, 0 }
  0x47   : > { %s193_s4 = sand.u32 (!%p7487_p0), 1, %s5815_s13   ;;  %p7488_p5 = scmp.ne.s32.totalorder (!%p7487_p0), %s7482_s21, 0 }
  0x48   : > { %191 = sbr.rel (%p7487_p0) target bundleno = 1483 (0x5cb), region = 28  ;;  %s194_s6 = scalar_lea.sflag (!%p7487_p0), [#allocation3], %s193_s4 }
  0x49   : > { %s5492_s5 = smul.u32 (!%p7487_p0), 104, %s193_s4 }
  0x4b   : > { %s5991_s7 = scalar_lea.vmem (!%p7487_p0), [#allocation2], %s5492_s5 }
  0x4f   : > { %5785 = dma.done.wait (%p7488_p5), %s194_s6, 1664  }
  0x50   : > { %5787 = vsyncadd (%p7488_p5), %s194_s6, 4294965632  ;;  %s203_s27 = scalar_lea.sflag [#allocation6], %s193_s4  ;;  %s5997_s8 = scalar_lea.vmem [#allocation5], %s5492_s5 }
  0x51   : > { %5789 = dma.done.wait (%p7488_p5), %s203_s27, 1664  }
  0x52   : > { %5791 = vsyncadd (%p7488_p5), %s203_s27, 4294965632  ;;  %v5833_v0 = vmov 0.0|0.0   ;;  %v7476_v1 = vmov 1.0|1.0   ;;  %v245_v2 = vld [vmem:[%s5991_s7] sm:$0xff]  ;;  %v247_v3 = vld [vmem:[%s5991_s7 + $0x10] sm:$0xff] }
  0x53   : > { %4971 = vmatprep.subr.bf16.mxu1 %v5833_v0  ;;  %271 = vmax.xlane.f32.xlu0 %v245_v2  ;;  %v246_v4 = vld [vmem:[%s5991_s7 + $0x8] sm:$0xff]  ;;  %v248_v5 = vld [vmem:[%s5991_s7 + $0x18] sm:$0xff]  ;;  %v249_v6 = vld [vmem:[%s5991_s7 + $0x20] sm:$0xff]  ;;  %v5835_v15 = vmov 0.0   ;;  %vm5836_vm0 = vmmov 0   ;;  %s3353_s21 = smul.u32 104, %s5819_s14 }
  0x54   : > { %4972 = vmatpush3.bf16.msra.mxu1 %v7476_v1  ;;  %275 = vmax.xlane.f32.xlu1 %v247_v3  ;;  %v250_v7 = vld [vmem:[%s5991_s7 + $0x28] sm:$0xff]  ;;  %v251_v8 = vld [vmem:[%s5991_s7 + $0x30] sm:$0xff]  ;;  %v6020_v9 = vld [vmem:[%s5991_s7 + $0x38] sm:$0xff]  ;;  %vm3409_vm3 = vcmask 7168   ;;  %s229_s18 = sand.u32 1, %s5803_s10   ;;  %s3571_s28 = sshll.u32 %s5819_s14, 7 }
  0x55   : > { %4973 = vmatprep.subr.bf16.mxu1 %v5833_v0  ;;  %v6026_v10 = vld [vmem:[%s5991_s7 + $0x40] sm:$0xff]  ;;  %v6029_v11 = vld [vmem:[%s5991_s7 + $0x48] sm:$0xff]  ;;  %v6036_v12 = vld [vmem:[%s5991_s7 + $0x50] sm:$0xff]  ;;  %4075 = vmatprep.subr.mxu0 %v5835_v15  ;;  %s3569_s20 = sshll.u32 %s229_s18, 3  ;;  %s7398_s23 = scalar_lea.hbm %s7453_s2, %s3571_s28 }
  0x56   : > { %v6039_v13 = vld [vmem:[%s5991_s7 + $0x58] sm:$0xff]  ;;  %v6046_v14 = vld [vmem:[%s5991_s7 + $0x60] sm:$0xff]  ;;  %4077 = vmatprep.mubr.msk.f32.mxu0 %vm5836_vm0, %v5835_v15  ;;  %4076 = vmatpush3.msra.mxu0 %v5835_v15  ;;  %s231_s3 = scalar_lea.vmem [#allocation7], %s3569_s20  ;;  %s3448_s30 = scalar_lea.sflag [#allocation4], %s229_s18 }
  0x57   : > { %273 = vmax.xlane.f32.xlu0 %v246_v4  ;;  %3995 = vmatprep.mubr.msk.f32.mxu1 %vm5836_vm0, %v5835_v15  ;;  %s3461_s29 = sshll.u32 %s231_s3, 4  ;;  %p7513_p8 = scmp.ne.s32.totalorder %s7483_s25, 0  ;;  %s7400_s29 = int_to_ptr.vmem [resolvable:$true] %s3461_s29 }
  0x58   : > { %4974 = vmatpush3.bf16.msra.mxu1 %v7476_v1  ;;  %277 = vmax.xlane.f32.xlu1 %v248_v5  ;;  %s5720_s4 = scalar_lea.vmem %s7400_s29, 128  ;;  %s5838_s14 = smov [#allocation7]  }
  0x59   : > { %4975 = vmatprep.subr.bf16.mxu1 %v5833_v0  ;;  %4987 = vmatprep.subr.bf16.mxu0 %v5833_v0  ;;  %p5721_p2 = scmp.ne.s32.totalorder %s7400_s29, %s5720_s4  ;;  %s5724_s5 = sshll.u32 %s5838_s14, 4  ;;  %s5725_s5 = int_to_ptr.vmem [resolvable:$false] %s5724_s5 }
  0x5a   : > { %s5726_s6 = scalar_lea.vmem %s5725_s5, 256  ;;  %p5727_p11 = scmp.lt.s32.totalorder %s7400_s29, %s5725_s5 }
  0x5b   : > { %279 = vmax.xlane.f32.xlu0 %v249_v6  ;;  %p5722_p9 = pnand %p5721_p2, %p7513_p8  ;;  %p5728_p1 = scmp.lt.s32.totalorder %s5726_s6, %s5720_s4 }
  0x5c   : > { %4976 = vmatpush3.bf16.msra.mxu1 %v7476_v1  ;;  %281 = vmax.xlane.f32.xlu1 %v250_v7 }
  0x5d   : > { %4977 = vmatprep.subr.bf16.mxu1 %v5833_v0  ;;  %p5723_p10 = pneg %p5722_p9  ;;  %p5729_p3 = por %p5728_p1, %p5727_p11 }
  0x5f   : > { %283 = vmax.xlane.f32.xlu0 %v251_v8  ;;  %p5730_p4 = pnand %p5729_p3, %p5723_p10 }
  0x60   : > { %4978 = vmatpush3.bf16.msra.mxu1 %v7476_v1  ;;  %285 = vmax.xlane.f32.xlu1 %v6020_v9 }
  0x61   : > { %4979 = vmatprep.subr.bf16.mxu1 %v5833_v0 }
  0x63   : > { %287 = vmax.xlane.f32.xlu0 %v6026_v10 }
  0x64   : > { %4980 = vmatpush3.bf16.msra.mxu1 %v7476_v1  ;;  %289 = vmax.xlane.f32.xlu1 %v6029_v11 }
  0x65   : > { %4981 = vmatprep.subr.bf16.mxu1 %v5833_v0 }
  0x67   : > { %291 = vmax.xlane.f32.xlu0 %v6036_v12 }
  0x68   : > { %4982 = vmatpush3.bf16.msra.mxu1 %v7476_v1  ;;  %293 = vmax.xlane.f32.xlu1 %v6039_v13 }
  0x69   : > { %4983 = vmatprep.subr.bf16.mxu1 %v5833_v0 }
  0x6b   : > { %295 = vmax.xlane.f32.xlu0 %v6046_v14 }
  0x6c   : > { %4984 = vmatpush3.bf16.msra.mxu1 %v7476_v1 }
  0x6d   : > { %4985 = vmatprep.subr.bf16.mxu1 %v5833_v0 }
  0x70   : > { %4986 = vmatpush3.bf16.msra.mxu1 %v7476_v1 }
  0x71   : > { %4034 = vmatprep.subr.mxu1 %v5835_v15 }
  0xe0   : > { %v6058_v16 = vpop.xlane.xlu0 %271 }
  0xe1   : > { %v6060_v17 = vpop.xlane.xlu1 %275  ;;  %v297_v18 = vsub.f32 %v245_v2, %v6058_v16 }
  0xe2   : > { %v299_v19 = vsub.f32 %v247_v3, %v6060_v17 }
  0xe3   : > { %v310_v20 = vmul.f32 1.442695, %v297_v18 }
  0xe4   : > { %v314_v21 = vmul.f32 1.442695, %v299_v19  ;;  %v6064_v22 = vpop.xlane.xlu0 %273 }
  0xe5   : > { %v6066_v23 = vpop.xlane.xlu1 %277  ;;  %5595 = vpow2.f32 %v310_v20  ;;  %v298_v24 = vsub.f32 %v246_v4, %v6064_v22 }
  0xe6   : > { %v300_v25 = vsub.f32 %v248_v5, %v6066_v23  ;;  %5597 = vpow2.f32 %v314_v21 }
  0xe7   : > { %v312_v26 = vmul.f32 1.442695, %v298_v24 }
  0xe8   : > { %v316_v27 = vmul.f32 1.442695, %v300_v25  ;;  %v6070_v28 = vpop.xlane.xlu0 %279 }
  0xe9   : > { %v6072_v29 = vpop.xlane.xlu1 %281  ;;  %5599 = vpow2.f32 %v312_v26  ;;  %v301_v30 = vsub.f32 %v249_v6, %v6070_v28 }
  0xea   : > { %v302_v31 = vsub.f32 %v250_v7, %v6072_v29  ;;  %5601 = vpow2.f32 %v316_v27 }
  0xeb   : > { %v318_v32 = vmul.f32 1.442695, %v301_v30 }
  0xec   : > { %v320_v33 = vmul.f32 1.442695, %v302_v31  ;;  %v6076_v34 = vpop.xlane.xlu0 %283 }
  0xed   : > { %v6078_v35 = vpop.xlane.xlu1 %285  ;;  %5603 = vpow2.f32 %v318_v32  ;;  %v303_v36 = vsub.f32 %v251_v8, %v6076_v34 }
  0xee   : > { %5605 = vpow2.f32 %v320_v33  ;;  %v304_v39 = vsub.f32 %v6020_v9, %v6078_v35 }
  0xef   : > { %v5596_v37 = vpop.eup %5595  ;;  %v322_v38 = vmul.f32 1.442695, %v303_v36 }
  0xf0   : > { %v5598_v40 = vpop.eup %5597  ;;  %v6083_v41 = vand.u32 4294901760, %v5596_v37  ;;  %v6085_v42 = vpop.xlane.xlu0 %287  ;;  %v324_v46 = vmul.f32 1.442695, %v304_v39 }
  0xf1   : > { %v6087_v43 = vand.u32 4294901760, %v5598_v40  ;;  %5607 = vpow2.f32 %v322_v38  ;;  %v305_v48 = vsub.f32 %v6026_v10, %v6085_v42  ;;  %v6097_v49 = vpop.xlane.xlu1 %289 }
  0xf2   : > { %v6090_v44 = vsub.f32 %v5596_v37, %v6083_v41  ;;  %v306_v56 = vsub.f32 %v6029_v11, %v6097_v49  ;;  %5609 = vpow2.f32 %v324_v46 }
  0xf3   : > { %v5600_v45 = vpop.eup %5599  ;;  %v6093_v47 = vsub.f32 %v5598_v40, %v6087_v43  ;;  %v326_v58 = vmul.f32 1.442695, %v305_v48 }
  0xf4   : > { %v5602_v50 = vpop.eup %5601  ;;  %4078 = vmatmul.mubr.f32.vlgmr.msra.gmra.mrb[0].mxu0 %v6090_v44  ;;  %v6100_v51 = vand.u32 4294901760, %v5600_v45  ;;  %v403_v52 = vand.u32 4294901760, %v6090_v44  ;;  %v6125_v3 = vpop.xlane.xlu0 %291  ;;  %v328_v5 = vmul.f32 1.442695, %v306_v56 }
  0xf5   : > { %4988 = vmatpush3.bf16.msra.mxu0 %v7476_v1  ;;  %4080 = vmatprep.mubr.msk.f32.mxu0 %vm5836_vm0, %v5835_v15  ;;  %v6106_v53 = vand.u32 4294901760, %v5602_v50  ;;  %v423_v59 = vand.u32 4294901760, %v6093_v47  ;;  %5611 = vpow2.f32 %v326_v58  ;;  %v307_v6 = vsub.f32 %v6036_v12, %v6125_v3  ;;  %v6149_v18 = vpop.xlane.xlu1 %293 }
  0xf6   : > { %v6109_v54 = vsub.f32 %v5600_v45, %v6100_v51  ;;  %v404_v55 = vsub.f32 %v6090_v44, %v403_v52  ;;  %4989 = vmatprep.subr.bf16.mxu0 %v5833_v0  ;;  %5613 = vpow2.f32 %v328_v5  ;;  %v308_v20 = vsub.f32 %v6039_v13, %v6149_v18 }
  0xf7   : > { %v5604_v57 = vpop.eup %5603  ;;  %v6121_v63 = vsub.f32 %v5602_v50, %v6106_v53  ;;  %v424_v9 = vsub.f32 %v6093_v47, %v423_v59  ;;  %v330_v19 = vmul.f32 1.442695, %v307_v6 }
  0xf8   : > { %v5606_v60 = vpop.eup %5605  ;;  %4081 = vmatmul.mubr.f32.gmra.mrb[2].mxu0 %v6109_v54  ;;  %v405_v61 = vand.u32 4294901760, %v404_v55  ;;  %v413_v62 = vand.u32 4294901760, %v6109_v54  ;;  %v6123_v2 = vand.u32 4294901760, %v5604_v57  ;;  %v6170_v30 = vpop.xlane.xlu0 %295  ;;  %v332_v13 = vmul.f32 1.442695, %v308_v20 }
  0xf9   : > { %4083 = vmatprep.mubr.msk.f32.mxu0 %vm5836_vm0, %v5835_v15  ;;  %4990 = vmatpush3.bf16.msra.mxu0 %v7476_v1  ;;  %v6138_v7 = vand.u32 4294901760, %v5606_v60  ;;  %v433_v11 = vand.u32 4294901760, %v6121_v63  ;;  %v425_v24 = vand.u32 4294901760, %v424_v9  ;;  %5615 = vpow2.f32 %v330_v19 }
  0xfa   : > { %3996 = vmatmul.mubr.f32.vlgmr.msra.gmra.mrb[0].mxu1 %v405_v61  ;;  %v414_v4 = vsub.f32 %v6109_v54, %v413_v62  ;;  %4991 = vmatprep.subr.bf16.mxu0 %v5833_v0  ;;  %v6146_v10 = vsub.f32 %v5604_v57, %v6123_v2  ;;  %v309_v32 = vsub.f32 %v6046_v14, %v6170_v30  ;;  %5617 = vpow2.f32 %v332_v13 }
  0xfb   : > { %3998 = vmatprep.mubr.msk.f32.mxu1 %vm5836_vm0, %v5835_v15  ;;  %4035 = vmatpush3.msra.mxu1 %v5835_v15  ;;  %v5608_v12 = vpop.eup %5607  ;;  %v6161_v21 = vsub.f32 %v5606_v60, %v6138_v7  ;;  %v434_v25 = vsub.f32 %v6121_v63, %v433_v11 }
  0xfc   : > { %4084 = vmatmul.mubr.f32.gmra.mrb[4].mxu0 %v6093_v47  ;;  %v415_v8 = vand.u32 4294901760, %v414_v4  ;;  %5115 = vmatprep.subr.bf16.mxu1 %v5833_v0  ;;  %v443_v26 = vand.u32 4294901760, %v6146_v10  ;;  %v6168_v27 = vand.u32 4294901760, %v5608_v12  ;;  %v5610_v31 = vpop.eup %5609  ;;  %v334_v14 = vmul.f32 1.442695, %v309_v32 }
  0xfd   : > { %4086 = vmatprep.mubr.msk.f32.mxu0 %vm5836_vm0, %v5835_v15  ;;  %4992 = vmatpush3.bf16.msra.mxu0 %v7476_v1  ;;  %v453_v33 = vand.u32 4294901760, %v6161_v21  ;;  %v435_v36 = vand.u32 4294901760, %v434_v25  ;;  %v6188_v39 = vand.u32 4294901760, %v5610_v31 }
  0xfe   : > { %3999 = vmatmul.mubr.f32.gmra.mrb[2].mxu1 %v415_v8  ;;  %4993 = vmatprep.subr.bf16.mxu0 %v5833_v0  ;;  %v444_v37 = vsub.f32 %v6146_v10, %v443_v26  ;;  %v6186_v38 = vsub.f32 %v5608_v12, %v6168_v27  ;;  %5619 = vpow2.f32 %v334_v14 }
  0xff   : > { %4001 = vmatprep.mubr.msk.f32.mxu1 %vm5836_vm0, %v5835_v15  ;;  %v5612_v40 = vpop.eup %5611  ;;  %v454_v45 = vsub.f32 %v6161_v21, %v453_v33  ;;  %v6201_v50 = vsub.f32 %v5610_v31, %v6188_v39 }
 0x100   : > { %4087 = vmatmul.mubr.f32.gmra.mrb[6].mxu0 %v6121_v63  ;;  %v5614_v46 = vpop.eup %5613  ;;  %v445_v48 = vand.u32 4294901760, %v444_v37  ;;  %v463_v55 = vand.u32 4294901760, %v6186_v38  ;;  %v6204_v56 = vand.u32 4294901760, %v5612_v40 }
 0x101   : > { %4089 = vmatprep.mubr.msk.f32.mxu0 %vm5836_vm0, %v5835_v15  ;;  %4994 = vmatpush3.bf16.msra.mxu0 %v7476_v1  ;;  %v6212_v57 = vand.u32 4294901760, %v5614_v46  ;;  %v455_v58 = vand.u32 4294901760, %v454_v45  ;;  %v473_v4 = vand.u32 4294901760, %v6201_v50 }
 0x102   : > { %4002 = vmatmul.mubr.f32.gmra.mrb[4].mxu1 %v425_v24  ;;  %4995 = vmatprep.subr.bf16.mxu0 %v5833_v0  ;;  %v464_v60 = vsub.f32 %v6186_v38, %v463_v55  ;;  %v6219_v61 = vsub.f32 %v5612_v40, %v6204_v56 }
 0x103   : > { %4004 = vmatprep.mubr.msk.f32.mxu1 %vm5836_vm0, %v5835_v15  ;;  %v5616_v5 = vpop.eup %5615  ;;  %v6229_v6 = vsub.f32 %v5614_v46, %v6212_v57  ;;  %v474_v9 = vsub.f32 %v6201_v50, %v473_v4 }
 0x104   : > { %4090 = vmatmul.mubr.f32.gmra.mrb[8].mxu0 %v6146_v10  ;;  %v465_v8 = vand.u32 4294901760, %v464_v60  ;;  %v483_v12 = vand.u32 4294901760, %v6219_v61  ;;  %v6236_v19 = vand.u32 4294901760, %v5616_v5  ;;  %v5618_v20 = vpop.eup %5617 }
 0x105   : > { %4092 = vmatprep.mubr.msk.f32.mxu0 %vm5836_vm0, %v5835_v15  ;;  %4996 = vmatpush3.bf16.msra.mxu0 %v7476_v1  ;;  %v493_v24 = vand.u32 4294901760, %v6229_v6  ;;  %v475_v25 = vand.u32 4294901760, %v474_v9  ;;  %v6252_v32 = vand.u32 4294901760, %v5618_v20 }
 0x106   : > { %4005 = vmatmul.mubr.f32.gmra.mrb[6].mxu1 %v435_v36  ;;  %4997 = vmatprep.subr.bf16.mxu0 %v5833_v0  ;;  %v484_v31 = vsub.f32 %v6219_v61, %v483_v12  ;;  %v6250_v13 = vsub.f32 %v5616_v5, %v6236_v19 }
 0x107   : > { %4007 = vmatprep.mubr.msk.f32.mxu1 %vm5836_vm0, %v5835_v15  ;;  %v494_v37 = vsub.f32 %v6229_v6, %v493_v24  ;;  %v6263_v14 = vsub.f32 %v5618_v20, %v6252_v32 }
 0x108   : > { %4093 = vmatmul.mubr.f32.gmra.mrb[10].mxu0 %v6161_v21  ;;  %v5620_v36 = vpop.eup %5619  ;;  %v485_v40 = vand.u32 4294901760, %v484_v31  ;;  %v503_v45 = vand.u32 4294901760, %v6250_v13 }
 0x109   : > { %4095 = vmatprep.mubr.msk.f32.mxu0 %vm5836_vm0, %v5835_v15  ;;  %4998 = vmatpush3.bf16.msra.mxu0 %v7476_v1  ;;  %v6266_v46 = vand.u32 4294901760, %v5620_v36  ;;  %v513_v5 = vand.u32 4294901760, %v6263_v14 }
 0x10a   : > { %4008 = vmatmul.mubr.f32.gmra.mrb[8].mxu1 %v445_v48  ;;  %4999 = vmatprep.subr.bf16.mxu0 %v5833_v0  ;;  %v495_v48 = vand.u32 4294901760, %v494_v37 }
 0x10b   : > { %4010 = vmatprep.mubr.msk.f32.mxu1 %vm5836_vm0, %v5835_v15  ;;  %v6277_v60 = vsub.f32 %v5620_v36, %v6266_v46  ;;  %v514_v9 = vsub.f32 %v6263_v14, %v513_v5 }
 0x10c   : > { %4096 = vmatmul.mubr.f32.gmra.mrb[12].mxu0 %v6186_v38 }
 0x10d   : > { %4098 = vmatprep.mubr.msk.f32.mxu0 %vm5836_vm0, %v5835_v15  ;;  %5000 = vmatpush3.bf16.msra.mxu0 %v7476_v1  ;;  %v523_v20 = vand.u32 4294901760, %v6277_v60 }
 0x10e   : > { %4011 = vmatmul.mubr.f32.gmra.mrb[10].mxu1 %v455_v58  ;;  %5001 = vmatprep.subr.bf16.mxu0 %v5833_v0  ;;  %v504_v58 = vsub.f32 %v6250_v13, %v503_v45 }
 0x10f   : > { %4013 = vmatprep.mubr.msk.f32.mxu1 %vm5836_vm0, %v5835_v15  ;;  %v524_v31 = vsub.f32 %v6277_v60, %v523_v20 }
 0x110   : > { %4099 = vmatmul.mubr.f32.gmra.mrb[14].mxu0 %v6201_v50 }
 0x111   : > { %4101 = vmatprep.mubr.msk.f32.mxu0 %vm5836_vm0, %v5835_v15  ;;  %5002 = vmatpush3.bf16.msra.mxu0 %v7476_v1  ;;  %v525_v36 = vand.u32 4294901760, %v524_v31 }
 0x112   : > { %4014 = vmatmul.mubr.f32.gmra.mrb[12].mxu1 %v465_v8  ;;  %4187 = vmatprep.subr.mxu0 %v5835_v15  ;;  %v505_v8 = vand.u32 4294901760, %v504_v58 }
 0x113   : > { %4016 = vmatprep.mubr.msk.f32.mxu1 %vm5836_vm0, %v5835_v15 }
 0x114   : > { %4102 = vmatmul.mubr.f32.gmra.mrb[16].mxu0 %v6219_v61 }
 0x115   : > { %4104 = vmatprep.mubr.msk.f32.mxu0 %vm5836_vm0, %v5835_v15 }
 0x116   : > { %4017 = vmatmul.mubr.f32.gmra.mrb[14].mxu1 %v475_v25  ;;  %v515_v25 = vand.u32 4294901760, %v514_v9 }
 0x117   : > { %4019 = vmatprep.mubr.msk.f32.mxu1 %vm5836_vm0, %v5835_v15 }
 0x118   : > { %4105 = vmatmul.mubr.f32.gmra.mrb[18].mxu0 %v6229_v6 }
 0x119   : > { %4107 = vmatprep.mubr.msk.f32.mxu0 %vm5836_vm0, %v5835_v15 }
 0x11a   : > { %4020 = vmatmul.mubr.f32.gmra.mrb[16].mxu1 %v485_v40 }
 0x11b   : > { %4022 = vmatprep.mubr.msk.f32.mxu1 %vm5836_vm0, %v5835_v15 }
 0x11c   : > { %4108 = vmatmul.mubr.f32.gmra.mrb[20].mxu0 %v6250_v13 }
 0x11d   : > { %4110 = vmatprep.mubr.msk.f32.mxu0 %vm5836_vm0, %v5835_v15 }
 0x11e   : > { %4023 = vmatmul.mubr.f32.gmra.mrb[18].mxu1 %v495_v48 }
 0x11f   : > { %4025 = vmatprep.mubr.msk.f32.mxu1 %vm5836_vm0, %v5835_v15 }
 0x120   : > { %4111 = vmatmul.mubr.f32.gmra.mrb[22].mxu0 %v6263_v14 }
 0x121   : > { %4113 = vmatprep.mubr.msk.f32.mxu0 %vm5836_vm0, %v5835_v15 }
 0x122   : > { %4026 = vmatmul.mubr.f32.gmra.mrb[20].mxu1 %v505_v8 }
 0x123   : > { %4028 = vmatprep.mubr.msk.f32.mxu1 %vm5836_vm0, %v5835_v15 }
 0x124   : > { %4114 = vmatmul.mubr.f32.gmra.mrb[24].mxu0 %v6277_v60 }
 0x125   : > { %4148 = vmatprep.mubr.msk.f32.mxu0 %vm5836_vm0, %v5835_v15 }
 0x126   : > { %4029 = vmatmul.mubr.f32.gmra.mrb[22].mxu1 %v515_v25 }
 0x127   : > { %4031 = vmatprep.mubr.msk.f32.mxu1 %vm5836_vm0, %v5835_v15 }
 0x128   : > { %4149 = vmatmul.mubr.f32.vlgmr.msra.gmra.mrb[0].mxu0 %v403_v52 }
 0x129   : > { %4188 = vmatpush3.msra.mxu0 %v5835_v15  ;;  %4151 = vmatprep.mubr.msk.f32.mxu0 %vm5836_vm0, %v5835_v15 }
 0x12a   : > { %4032 = vmatmul.mubr.f32.gmra.mrb[24].mxu1 %v525_v36  ;;  %5003 = vmatprep.subr.bf16.mxu0 %v5833_v0 }
 0x12b   : > { %4036 = vmatprep.mubr.msk.f32.mxu1 %vm5836_vm0, %v5835_v15 }
 0x12c   : > { %4152 = vmatmul.mubr.f32.gmra.mrb[2].mxu0 %v413_v62 }
 0x12d   : > { %4154 = vmatprep.mubr.msk.f32.mxu0 %vm5836_vm0, %v5835_v15 }
 0x12e   : > { %4037 = vmatmul.mubr.f32.vlgmr.msra.gmra.mrb[0].mxu1 %v6083_v41 }
 0x12f   : > { %4039 = vmatprep.mubr.msk.f32.mxu1 %vm5836_vm0, %v5835_v15  ;;  %5123 = vmatpush3.bf16.msra.mxu1 %v7476_v1 }
 0x130   : > { %4155 = vmatmul.mubr.f32.gmra.mrb[4].mxu0 %v423_v59  ;;  %5116 = vmatprep.subr.bf16.mxu1 %v5833_v0 }
 0x131   : > { %4157 = vmatprep.mubr.msk.f32.mxu0 %vm5836_vm0, %v5835_v15 }
 0x132   : > { %4040 = vmatmul.mubr.f32.gmra.mrb[2].mxu1 %v6100_v51 }
 0x133   : > { %4042 = vmatprep.mubr.msk.f32.mxu1 %vm5836_vm0, %v5835_v15  ;;  %5124 = vmatpush3.bf16.msra.mxu1 %v7476_v1 }
 0x134   : > { %4158 = vmatmul.mubr.f32.gmra.mrb[6].mxu0 %v433_v11  ;;  %5117 = vmatprep.subr.bf16.mxu1 %v5833_v0 }
 0x135   : > { %4189 = vmatprep.mubr.msk.f32.mxu0 %vm5836_vm0, %v5835_v15 }
 0x136   : > { %4043 = vmatmul.mubr.f32.gmra.mrb[4].mxu1 %v6087_v43 }
 0x137   : > { %4045 = vmatprep.mubr.msk.f32.mxu1 %vm5836_vm0, %v5835_v15  ;;  %5125 = vmatpush3.bf16.msra.mxu1 %v7476_v1 }
 0x138   : > { %4190 = vmatmul.mubr.f32.vlgmr.msra.gmra.mrb[0].mxu0 %v6083_v41  ;;  %5118 = vmatprep.subr.bf16.mxu1 %v5833_v0 }
 0x139   : > { %5004 = vmatpush3.bf16.msra.mxu0 %v7476_v1  ;;  %4192 = vmatprep.mubr.msk.f32.mxu0 %vm5836_vm0, %v5835_v15 }
 0x13a   : > { %4046 = vmatmul.mubr.f32.gmra.mrb[6].mxu1 %v6106_v53  ;;  %5005 = vmatprep.subr.bf16.mxu0 %v5833_v0 }
 0x13b   : > { %4048 = vmatprep.mubr.msk.f32.mxu1 %vm5836_vm0, %v5835_v15  ;;  %5126 = vmatpush3.bf16.msra.mxu1 %v7476_v1 }
 0x13c   : > { %4193 = vmatmul.mubr.f32.gmra.mrb[2].mxu0 %v6100_v51  ;;  %5119 = vmatprep.subr.bf16.mxu1 %v5833_v0 }
 0x13d   : > { %4195 = vmatprep.mubr.msk.f32.mxu0 %vm5836_vm0, %v5835_v15  ;;  %5006 = vmatpush3.bf16.msra.mxu0 %v7476_v1 }
 0x13e   : > { %4049 = vmatmul.mubr.f32.gmra.mrb[8].mxu1 %v6123_v2  ;;  %5007 = vmatprep.subr.bf16.mxu0 %v5833_v0 }
 0x13f   : > { %4051 = vmatprep.mubr.msk.f32.mxu1 %vm5836_vm0, %v5835_v15  ;;  %5127 = vmatpush3.bf16.msra.mxu1 %v7476_v1 }
 0x140   : > { %4196 = vmatmul.mubr.f32.gmra.mrb[4].mxu0 %v6087_v43  ;;  %5120 = vmatprep.subr.bf16.mxu1 %v5833_v0 }
 0x141   : > { %4198 = vmatprep.mubr.msk.f32.mxu0 %vm5836_vm0, %v5835_v15  ;;  %5008 = vmatpush3.bf16.msra.mxu0 %v7476_v1 }
 0x142   : > { %4052 = vmatmul.mubr.f32.gmra.mrb[10].mxu1 %v6138_v7  ;;  %5009 = vmatprep.subr.bf16.mxu0 %v5833_v0 }
 0x143   : > { %4054 = vmatprep.mubr.msk.f32.mxu1 %vm5836_vm0, %v5835_v15  ;;  %5128 = vmatpush3.bf16.msra.mxu1 %v7476_v1 }
 0x144   : > { %4199 = vmatmul.mubr.f32.gmra.mrb[6].mxu0 %v6106_v53  ;;  %5121 = vmatprep.subr.bf16.mxu1 %v5833_v0 }
 0x145   : > { %4201 = vmatprep.mubr.msk.f32.mxu0 %vm5836_vm0, %v5835_v15  ;;  %5010 = vmatpush3.bf16.msra.mxu0 %v7476_v1 }
 0x146   : > { %4055 = vmatmul.mubr.f32.gmra.mrb[12].mxu1 %v6168_v27  ;;  %5011 = vmatprep.subr.bf16.mxu0 %v5833_v0 }
 0x147   : > { %4057 = vmatprep.mubr.msk.f32.mxu1 %vm5836_vm0, %v5835_v15  ;;  %5129 = vmatpush3.bf16.msra.mxu1 %v7476_v1 }
 0x148   : > { %4202 = vmatmul.mubr.f32.gmra.mrb[26].mxu0 %v6123_v2  ;;  %5122 = vmatprep.subr.bf16.mxu1 %v5833_v0 }
 0x149   : > { %4204 = vmatprep.mubr.msk.f32.mxu0 %vm5836_vm0, %v5835_v15  ;;  %5012 = vmatpush3.bf16.msra.mxu0 %v7476_v1 }
 0x14a   : > { %4058 = vmatmul.mubr.f32.gmra.mrb[14].mxu1 %v6188_v39  ;;  %5013 = vmatprep.subr.bf16.mxu0 %v5833_v0 }
 0x14b   : > { %4060 = vmatprep.mubr.msk.f32.mxu1 %vm5836_vm0, %v5835_v15  ;;  %5130 = vmatpush3.bf16.msra.mxu1 %v7476_v1 }
 0x14c   : > { %4205 = vmatmul.mubr.f32.gmra.mrb[28].mxu0 %v6138_v7  ;;  %5019 = vmatprep.subr.bf16.mxu1 %v5833_v0 }
 0x14d   : > { %4207 = vmatprep.mubr.msk.f32.mxu0 %vm5836_vm0, %v5835_v15  ;;  %5014 = vmatpush3.bf16.msra.mxu0 %v7476_v1 }
 0x14e   : > { %4061 = vmatmul.mubr.f32.gmra.mrb[16].mxu1 %v6204_v56  ;;  %5015 = vmatprep.subr.bf16.mxu0 %v5833_v0 }
 0x14f   : > { %4063 = vmatprep.mubr.msk.f32.mxu1 %vm5836_vm0, %v5835_v15 }
 0x150   : > { %4208 = vmatmul.mubr.f32.gmra.mrb[30].mxu0 %v6168_v27 }
 0x151   : > { %4210 = vmatprep.mubr.msk.f32.mxu0 %vm5836_vm0, %v5835_v15  ;;  %5016 = vmatpush3.bf16.msra.mxu0 %v7476_v1 }
 0x152   : > { %4064 = vmatmul.mubr.f32.gmra.mrb[18].mxu1 %v6212_v57  ;;  %5017 = vmatprep.subr.bf16.mxu0 %v5833_v0 }
 0x153   : > { %4066 = vmatprep.mubr.msk.f32.mxu1 %vm5836_vm0, %v5835_v15 }
 0x154   : > { %4211 = vmatmul.mubr.f32.gmra.mrb[32].mxu0 %v6188_v39 }
 0x155   : > { %4213 = vmatprep.mubr.msk.f32.mxu0 %vm5836_vm0, %v5835_v15  ;;  %5018 = vmatpush3.bf16.msra.mxu0 %v7476_v1 }
 0x156   : > { %4067 = vmatmul.mubr.f32.gmra.mrb[20].mxu1 %v6236_v19  ;;  %5067 = vmatprep.subr.bf16.mxu0 %v5833_v0 }
 0x157   : > { %4069 = vmatprep.mubr.msk.f32.mxu1 %vm5836_vm0, %v5835_v15 }
 0x158   : > { %4214 = vmatmul.mubr.f32.gmra.mrb[34].mxu0 %v6204_v56 }
 0x159   : > { %4216 = vmatprep.mubr.msk.f32.mxu0 %vm5836_vm0, %v5835_v15 }
 0x15a   : > { %4070 = vmatmul.mubr.f32.gmra.mrb[22].mxu1 %v6252_v32 }
 0x15b   : > { %4072 = vmatprep.mubr.msk.f32.mxu1 %vm5836_vm0, %v5835_v15 }
 0x15c   : > { %4217 = vmatmul.mubr.f32.gmra.mrb[36].mxu0 %v6212_v57 }
 0x15d   : > { %4219 = vmatprep.mubr.msk.f32.mxu0 %vm5836_vm0, %v5835_v15 }
 0x15e   : > { %4073 = vmatmul.mubr.f32.gmra.mrb[24].mxu1 %v6266_v46 }
 0x15f   : > { %4160 = vmatprep.mubr.msk.f32.mxu1 %vm5836_vm0, %v5835_v15 }
 0x160   : > { %4220 = vmatmul.mubr.f32.gmra.mrb[38].mxu0 %v6236_v19 }
 0x161   : > { %4222 = vmatprep.mubr.msk.f32.mxu0 %vm5836_vm0, %v5835_v15 }
 0x162   : > { %4161 = vmatmul.mubr.f32.vlgmr.msra.gmra.mrb[26].mxu1 %v443_v26 }
 0x163   : > { %4163 = vmatprep.mubr.msk.f32.mxu1 %vm5836_vm0, %v5835_v15  ;;  %5020 = vmatpush3.bf16.msra.mxu1 %v7476_v1 }
 0x164   : > { %4223 = vmatmul.mubr.f32.gmra.mrb[40].mxu0 %v6252_v32  ;;  %5021 = vmatprep.subr.bf16.mxu1 %v5833_v0 }
 0x165   : > { %4225 = vmatprep.mubr.msk.f32.mxu0 %vm5836_vm0, %v5835_v15 }
 0x166   : > { %4164 = vmatmul.mubr.f32.gmra.mrb[28].mxu1 %v453_v33 }
 0x167   : > { %4166 = vmatprep.mubr.msk.f32.mxu1 %vm5836_vm0, %v5835_v15  ;;  %5022 = vmatpush3.bf16.msra.mxu1 %v7476_v1 }
 0x168   : > { %4226 = vmatmul.mubr.f32.gmra.mrb[42].mxu0 %v6266_v46  ;;  %5023 = vmatprep.subr.bf16.mxu1 %v5833_v0 }
 0x169   : > { %4260 = vmatprep.mubr.msk.f32.mxu0 %vm5836_vm0, %v5835_v15 }
 0x16a   : > { %4167 = vmatmul.mubr.f32.gmra.mrb[30].mxu1 %v463_v55 }
 0x16b   : > { %4169 = vmatprep.mubr.msk.f32.mxu1 %vm5836_vm0, %v5835_v15  ;;  %5024 = vmatpush3.bf16.msra.mxu1 %v7476_v1 }
 0x16c   : > { %4261 = vmatmul.mubr.f32.vlgmr.msra.gmra.mrb[0].mxu0 %v6083_v41  ;;  %5025 = vmatprep.subr.bf16.mxu1 %v5833_v0  ;;  %v5837_v41 = vmov 0  }
 0x16d   : > { %4263 = vmatprep.mubr.msk.f32.mxu0 %vm5836_vm0, %v5835_v15  ;;  %5068 = vmatpush3.bf16.msra.mxu0 %v7476_v1 }
 0x16e   : > { %4170 = vmatmul.mubr.f32.gmra.mrb[32].mxu1 %v473_v4  ;;  %5069 = vmatprep.subr.bf16.mxu0 %v5833_v0 }
 0x16f   : > { %4172 = vmatprep.mubr.msk.f32.mxu1 %vm5836_vm0, %v5835_v15  ;;  %5026 = vmatpush3.bf16.msra.mxu1 %v7476_v1 }
 0x170   : > { %4264 = vmatmul.mubr.f32.gmra.mrb[2].mxu0 %v6100_v51  ;;  %5027 = vmatprep.subr.bf16.mxu1 %v5833_v0 }
 0x171   : > { %4266 = vmatprep.mubr.msk.f32.mxu0 %vm5836_vm0, %v5835_v15  ;;  %5070 = vmatpush3.bf16.msra.mxu0 %v7476_v1 }
 0x172   : > { %4173 = vmatmul.mubr.f32.gmra.mrb[34].mxu1 %v483_v12  ;;  %5071 = vmatprep.subr.bf16.mxu0 %v5833_v0 }
 0x173   : > { %4175 = vmatprep.mubr.msk.f32.mxu1 %vm5836_vm0, %v5835_v15  ;;  %5028 = vmatpush3.bf16.msra.mxu1 %v7476_v1 }
 0x174   : > { %4267 = vmatmul.mubr.f32.gmra.mrb[4].mxu0 %v6087_v43  ;;  %5029 = vmatprep.subr.bf16.mxu1 %v5833_v0 }
 0x175   : > { %4269 = vmatprep.mubr.msk.f32.mxu0 %vm5836_vm0, %v5835_v15  ;;  %5072 = vmatpush3.bf16.msra.mxu0 %v7476_v1 }
 0x176   : > { %4176 = vmatmul.mubr.f32.gmra.mrb[36].mxu1 %v493_v24  ;;  %5073 = vmatprep.subr.bf16.mxu0 %v5833_v0 }
 0x177   : > { %4178 = vmatprep.mubr.msk.f32.mxu1 %vm5836_vm0, %v5835_v15  ;;  %5030 = vmatpush3.bf16.msra.mxu1 %v7476_v1 }
 0x178   : > { %4270 = vmatmul.mubr.f32.gmra.mrb[6].mxu0 %v6106_v53  ;;  %5031 = vmatprep.subr.bf16.mxu1 %v5833_v0 }
 0x179   : > { %4272 = vmatprep.mubr.msk.f32.mxu0 %vm5836_vm0, %v5835_v15  ;;  %5074 = vmatpush3.bf16.msra.mxu0 %v7476_v1 }
 0x17a   : > { %4179 = vmatmul.mubr.f32.gmra.mrb[38].mxu1 %v503_v45  ;;  %5075 = vmatprep.subr.bf16.mxu0 %v5833_v0 }
 0x17b   : > { %4181 = vmatprep.mubr.msk.f32.mxu1 %vm5836_vm0, %v5835_v15  ;;  %5032 = vmatpush3.bf16.msra.mxu1 %v7476_v1 }
 0x17c   : > { %4273 = vmatmul.mubr.f32.gmra.mrb[26].mxu0 %v6123_v2  ;;  %5033 = vmatprep.subr.bf16.mxu1 %v5833_v0 }
 0x17d   : > { %4275 = vmatprep.mubr.msk.f32.mxu0 %vm5836_vm0, %v5835_v15  ;;  %5076 = vmatpush3.bf16.msra.mxu0 %v7476_v1 }
 0x17e   : > { %4182 = vmatmul.mubr.f32.gmra.mrb[40].mxu1 %v513_v5  ;;  %5077 = vmatprep.subr.bf16.mxu0 %v5833_v0 }
 0x17f   : > { %4184 = vmatprep.mubr.msk.f32.mxu1 %vm5836_vm0, %v5835_v15  ;;  %5034 = vmatpush3.bf16.msra.mxu1 %v7476_v1 }
 0x180   : > { %4276 = vmatmul.mubr.f32.gmra.mrb[28].mxu0 %v6138_v7  ;;  %4370 = vmatprep.subr.mxu1 %v5835_v15 }
 0x181   : > { %4278 = vmatprep.mubr.msk.f32.mxu0 %vm5836_vm0, %v5835_v15  ;;  %5078 = vmatpush3.bf16.msra.mxu0 %v7476_v1 }
 0x182   : > { %4185 = vmatmul.mubr.f32.gmra.mrb[42].mxu1 %v523_v20  ;;  %5079 = vmatprep.subr.bf16.mxu0 %v5833_v0 }
 0x183   : > { %4331 = vmatprep.mubr.msk.f32.mxu1 %vm5836_vm0, %v5835_v15  ;;  %5593 = vset.pattern.permute.xlu1 %v5837_v41 }
 0x184   : > { %4279 = vmatmul.mubr.f32.gmra.mrb[30].mxu0 %v6168_v27  ;;  %5594 = vset.pattern.permute.xlu0 %v5837_v41 }
 0x185   : > { %4281 = vmatprep.mubr.msk.f32.mxu0 %vm5836_vm0, %v5835_v15  ;;  %5080 = vmatpush3.bf16.msra.mxu0 %v7476_v1 }
 0x186   : > { %5081 = vmatprep.subr.bf16.mxu0 %v5833_v0 }
 0x188   : > { %4282 = vmatmul.mubr.f32.gmra.mrb[32].mxu0 %v6188_v39 }
 0x189   : > { %4284 = vmatprep.mubr.msk.f32.mxu0 %vm5836_vm0, %v5835_v15  ;;  %5082 = vmatpush3.bf16.msra.mxu0 %v7476_v1 }
 0x18a   : > { %4706 = vmatprep.subr.mxu0 %v5835_v15 }
 0x18c   : > { %4285 = vmatmul.mubr.f32.gmra.mrb[34].mxu0 %v6204_v56 }
 0x18d   : > { %4287 = vmatprep.mubr.msk.f32.mxu0 %vm5836_vm0, %v5835_v15 }
 0x190   : > { %4288 = vmatmul.mubr.f32.gmra.mrb[36].mxu0 %v6212_v57 }
 0x191   : > { %4290 = vmatprep.mubr.msk.f32.mxu0 %vm5836_vm0, %v5835_v15 }
 0x194   : > { %4291 = vmatmul.mubr.f32.gmra.mrb[38].mxu0 %v6236_v19 }
 0x195   : > { %4293 = vmatprep.mubr.msk.f32.mxu0 %vm5836_vm0, %v5835_v15 }
 0x198   : > { %4294 = vmatmul.mubr.f32.gmra.mrb[40].mxu0 %v6252_v32 }
 0x199   : > { %4296 = vmatprep.mubr.msk.f32.mxu0 %vm5836_vm0, %v5835_v15 }
 0x19c   : > { %4297 = vmatmul.mubr.f32.gmra.mrb[42].mxu0 %v6266_v46 }
 0x19d   : > { %4667 = vmatprep.mubr.msk.f32.mxu0 %vm5836_vm0, %v5835_v15 }
 0x1d7   : > { %v770_v43 = vpop.f32.mrb[8].mxu0 }
 0x1d8   : > { %v4091_v44 = vpop.f32.mrb[9].mxu0 }
 0x1db   : > { %v777_v47 = vpop.f32.mrb[10].mxu0 }
 0x1dc   : > { %v4094_v51 = vpop.f32.mrb[11].mxu0 }
 0x1df   : > { %v784_v52 = vpop.f32.mrb[12].mxu0 }
 0x1e0   : > { %v4097_v53 = vpop.f32.mrb[13].mxu0 }
 0x1e3   : > { %v791_v54 = vpop.f32.mrb[14].mxu0 }
 0x1e4   : > { %v4100_v59 = vpop.f32.mrb[15].mxu0 }
 0x1e7   : > { %v798_v62 = vpop.f32.mrb[16].mxu0 }
 0x1e8   : > { %v4103_v63 = vpop.f32.mrb[17].mxu0 }
 0x1eb   : > { %v805_v2 = vpop.f32.mrb[18].mxu0 }
 0x1ec   : > { %v4106_v7 = vpop.f32.mrb[19].mxu0 }
 0x1ef   : > { %v812_v10 = vpop.f32.mrb[20].mxu0 }
 0x1f0   : > { %v4109_v11 = vpop.f32.mrb[21].mxu0 }
 0x1f3   : > { %v819_v21 = vpop.f32.mrb[22].mxu0 }
 0x1f4   : > { %v4112_v26 = vpop.f32.mrb[23].mxu0 }
 0x1f7   : > { %v826_v27 = vpop.f32.mrb[24].mxu0 }
 0x1f8   : > { %v4115_v33 = vpop.f32.mrb[25].mxu0 }
 0x201   : > { %v598_v38 = vpop.f32.mrb[0].mxu1 }
 0x202   : > { %v4038_v39 = vpop.f32.mrb[1].mxu1 }
 0x205   : > { %v604_v50 = vpop.f32.mrb[2].mxu1 }
 0x206   : > { %v4041_v55 = vpop.f32.mrb[3].mxu1 }
 0x209   : > { %v610_v56 = vpop.f32.mrb[4].mxu1 }
 0x20a   : > { %v4044_v57 = vpop.f32.mrb[5].mxu1 }
 0x20d   : > { %v616_v61 = vpop.f32.mrb[6].mxu1 }
 0x20e   : > { %v4047_v4 = vpop.f32.mrb[7].mxu1 }
 0x211   : > { %v622_v6 = vpop.f32.mrb[8].mxu1 }
 0x212   : > { %v5135_v12 = vadd.f32 %v770_v43, %v622_v6  ;;  %v4050_v19 = vpop.f32.mrb[9].mxu1 }
 0x215   : > { %v628_v24 = vpop.f32.mrb[10].mxu1 }
 0x216   : > { %v5138_v13 = vadd.f32 %v777_v47, %v628_v24  ;;  %v4053_v32 = vpop.f32.mrb[11].mxu1 }
 0x219   : > { %v634_v37 = vpop.f32.mrb[12].mxu1 }
 0x21a   : > { %v5141_v40 = vadd.f32 %v784_v52, %v634_v37  ;;  %v4056_v14 = vpop.f32.mrb[13].mxu1 }
 0x21d   : > { %v640_v45 = vpop.f32.mrb[14].mxu1 }
 0x21e   : > { %v5144_v46 = vadd.f32 %v791_v54, %v640_v45  ;;  %v4059_v48 = vpop.f32.mrb[15].mxu1 }
 0x221   : > { %v646_v58 = vpop.f32.mrb[16].mxu1 }
 0x222   : > { %v5147_v60 = vadd.f32 %v798_v62, %v646_v58  ;;  %v4062_v5 = vpop.f32.mrb[17].mxu1 }
 0x225   : > { %v652_v8 = vpop.f32.mrb[18].mxu1 }
 0x226   : > { %v5150_v9 = vadd.f32 %v805_v2, %v652_v8  ;;  %v4065_v20 = vpop.f32.mrb[19].mxu1 }
 0x229   : > { %v658_v25 = vpop.f32.mrb[20].mxu1 }
 0x22a   : > { %v5153_v31 = vadd.f32 %v812_v10, %v658_v25  ;;  %v4068_v36 = vpop.f32.mrb[21].mxu1 }
 0x22d   : > { %v664_v41 = vpop.f32.mrb[22].mxu1 }
 0x22e   : > { %v5156_v43 = vadd.f32 %v819_v21, %v664_v41  ;;  %v4071_v44 = vpop.f32.mrb[23].mxu1 }
 0x231   : > { %v670_v47 = vpop.f32.mrb[24].mxu1 }
 0x232   : > { %v5159_v51 = vadd.f32 %v826_v27, %v670_v47  ;;  %v4074_v53 = vpop.f32.mrb[25].mxu1 }
 0x235   : > { %v931_v52 = vpop.f32.mrb[26].mxu1 }
 0x236   : > { %v5136_v59 = vadd.f32 %v5135_v12, %v931_v52  ;;  %v4162_v63 = vpop.f32.mrb[27].mxu1 }
 0x239   : > { %v939_v54 = vpop.f32.mrb[28].mxu1 }
 0x23a   : > { %v5139_v7 = vadd.f32 %v5138_v13, %v939_v54  ;;  %v4165_v11 = vpop.f32.mrb[29].mxu1 }
 0x23d   : > { %v947_v62 = vpop.f32.mrb[30].mxu1 }
 0x23e   : > { %v5142_v26 = vadd.f32 %v5141_v40, %v947_v62  ;;  %v4168_v33 = vpop.f32.mrb[31].mxu1 }
 0x23f   : > { %v1209_v2 = vpop.f32.mrb[0].mxu0 }
 0x240   : > { %v5131_v39 = vadd.f32 %v1209_v2, %v598_v38  ;;  %v4262_v55 = vpop.f32.mrb[1].mxu0 }
 0x241   : > { %v955_v10 = vpop.f32.mrb[32].mxu1 }
 0x242   : > { %5621 = vlog2.f32 %v5131_v39  ;;  %v5145_v57 = vadd.f32 %v5144_v46, %v955_v10  ;;  %v4171_v21 = vpop.f32.mrb[33].mxu1 }
 0x243   : > { %v1215_v4 = vpop.f32.mrb[2].mxu0 }
 0x244   : > { %v5132_v6 = vadd.f32 %v1215_v4, %v604_v50  ;;  %v4265_v27 = vpop.f32.mrb[3].mxu0 }
 0x245   : > { %v963_v19 = vpop.f32.mrb[34].mxu1 }
 0x246   : > { %5623 = vlog2.f32 %v5132_v6  ;;  %v5148_v12 = vadd.f32 %v5147_v60, %v963_v19  ;;  %v4174_v24 = vpop.f32.mrb[35].mxu1 }
 0x247   : > { %v1221_v32 = vpop.f32.mrb[4].mxu0 }
 0x248   : > { %v5133_v13 = vadd.f32 %v1221_v32, %v610_v56  ;;  %v4268_v37 = vpop.f32.mrb[5].mxu0 }
 0x249   : > { %v971_v14 = vpop.f32.mrb[36].mxu1 }
 0x24a   : > { %5625 = vlog2.f32 %v5133_v13  ;;  %v5151_v40 = vadd.f32 %v5150_v9, %v971_v14  ;;  %v4177_v45 = vpop.f32.mrb[37].mxu1 }
 0x24b   : > { %v1227_v38 = vpop.f32.mrb[6].mxu0 }
 0x24c   : > { %v5622_v48 = vpop.eup %5621  ;;  %v5134_v58 = vadd.f32 %v1227_v38, %v616_v61  ;;  %v4271_v5 = vpop.f32.mrb[7].mxu0 }
 0x24d   : > { %v1286_v46 = vmul.f32 0.6931472, %v5622_v48  ;;  %v979_v8 = vpop.f32.mrb[38].mxu1 }
 0x24e   : > { %5627 = vlog2.f32 %v5134_v58  ;;  %v5154_v50 = vadd.f32 %v5153_v31, %v979_v8  ;;  %v4180_v20 = vpop.f32.mrb[39].mxu1 }
 0x24f   : > { %v1233_v25 = vpop.f32.mrb[26].mxu0  ;;  %v1311_v60 = vadd.f32 %v1286_v46, %v6058_v16 }
 0x250   : > { %v5624_v36 = vpop.eup %5623  ;;  %v5137_v41 = vadd.f32 %v5136_v59, %v1233_v25  ;;  %v4274_v56 = vpop.f32.mrb[27].mxu0 }
 0x251   : > { %v1288_v44 = vmul.f32 0.6931472, %v5624_v36  ;;  %1326 = vperm.xlu1 %5593, %v1311_v60   ;;  %v987_v47 = vpop.f32.mrb[40].mxu1 }
 0x252   : > { %5629 = vlog2.f32 %v5137_v41  ;;  %v5157_v9 = vadd.f32 %v5156_v43, %v987_v47  ;;  %v4183_v53 = vpop.f32.mrb[41].mxu1 }
 0x253   : > { %v1239_v52 = vpop.f32.mrb[28].mxu0  ;;  %v1312_v61 = vadd.f32 %v1288_v44, %v6064_v22 }
 0x254   : > { %v5626_v63 = vpop.eup %5625  ;;  %v5140_v54 = vadd.f32 %v5139_v7, %v1239_v52  ;;  %v4277_v11 = vpop.f32.mrb[29].mxu0 }
 0x255   : > { %v1290_v31 = vmul.f32 0.6931472, %v5626_v63  ;;  %1331 = vperm.xlu0 %5594, %v1312_v61   ;;  %v995_v62 = vpop.f32.mrb[42].mxu1 }
 0x256   : > { %5631 = vlog2.f32 %v5140_v54  ;;  %v5160_v16 = vadd.f32 %v5159_v51, %v995_v62  ;;  %v4186_v33 = vpop.f32.mrb[43].mxu1 }
 0x257   : > { %v1245_v59 = vpop.f32.mrb[30].mxu0  ;;  %v1313_v2 = vadd.f32 %v1290_v31, %v6060_v17  ;;  %v5647_v31 = vld [vmem:[%s5991_s7] sm:$0xff] }
 0x258   : > { %v5628_v39 = vpop.eup %5627  ;;  %v5143_v55 = vadd.f32 %v5142_v26, %v1245_v59  ;;  %v4280_v10 = vpop.f32.mrb[31].mxu0 }
 0x259   : > { %v1292_v43 = vmul.f32 0.6931472, %v5628_v39  ;;  %1336 = vperm.xlu1 %5593, %v1313_v2   ;;  %v5648_v39 = vld [vmem:[%s5991_s7 + $0x8] sm:$0xff] }
 0x25a   : > { %5633 = vlog2.f32 %v5143_v55 }
 0x25b   : > { %v1251_v21 = vpop.f32.mrb[32].mxu0  ;;  %v1314_v22 = vadd.f32 %v1292_v43, %v6066_v23 }
 0x25c   : > { %v5630_v7 = vpop.eup %5629  ;;  %v5146_v4 = vadd.f32 %v5145_v57, %v1251_v21  ;;  %v4283_v6 = vpop.f32.mrb[33].mxu0 }
 0x25d   : > { %v1294_v27 = vmul.f32 0.6931472, %v5630_v7  ;;  %1341 = vperm.xlu1 %5593, %v1314_v22  }
 0x25e   : > { %5635 = vlog2.f32 %v5146_v4 }
 0x25f   : > { %v1257_v51 = vpop.f32.mrb[34].mxu0  ;;  %v1315_v19 = vadd.f32 %v1294_v27, %v6070_v28 }
 0x260   : > { %v5632_v24 = vpop.eup %5631  ;;  %v5149_v17 = vadd.f32 %v5148_v12, %v1257_v51  ;;  %v4286_v32 = vpop.f32.mrb[35].mxu0  ;;  %v260_v51 = vld [vmem:[%s5997_s8 + $0x10] sm:$0xff] }
 0x261   : > { %v1296_v26 = vmul.f32 0.6931472, %v5632_v24  ;;  %1346 = vperm.xlu1 %5593, %v1315_v19   ;;  %v5649_v19 = vld [vmem:[%s5991_s7 + $0x10] sm:$0xff] }
 0x262   : > { %5637 = vlog2.f32 %v5149_v17 }
 0x263   : > { %v1263_v13 = vpop.f32.mrb[36].mxu0  ;;  %v1316_v37 = vadd.f32 %v1296_v26, %v6072_v29 }
 0x264   : > { %v5634_v14 = vpop.eup %5633  ;;  %v5152_v23 = vadd.f32 %v5151_v40, %v1263_v13  ;;  %v4289_v45 = vpop.f32.mrb[37].mxu0 }
 0x265   : > { %v1298_v57 = vmul.f32 0.6931472, %v5634_v14  ;;  %1351 = vperm.xlu1 %5593, %v1316_v37  }
 0x266   : > { %5639 = vlog2.f32 %v5152_v23  ;;  %v261_v23 = vld [vmem:[%s5997_s8 + $0x18] sm:$0xff] }
 0x267   : > { %v1269_v38 = vpop.f32.mrb[38].mxu0  ;;  %v1317_v48 = vadd.f32 %v1298_v57, %v6076_v34  ;;  %v5650_v57 = vld [vmem:[%s5991_s7 + $0x18] sm:$0xff] }
 0x268   : > { %v5636_v58 = vpop.eup %5635  ;;  %v5155_v28 = vadd.f32 %v5154_v50, %v1269_v38  ;;  %v4292_v5 = vpop.f32.mrb[39].mxu0 }
 0x269   : > { %v1300_v12 = vmul.f32 0.6931472, %v5636_v58  ;;  %1356 = vperm.xlu1 %5593, %v1317_v48  }
 0x26a   : > { %5641 = vlog2.f32 %v5155_v28 }
 0x26b   : > { %v1275_v46 = vpop.f32.mrb[40].mxu0  ;;  %v1318_v8 = vadd.f32 %v1300_v12, %v6078_v35 }
 0x26c   : > { %v5638_v20 = vpop.eup %5637  ;;  %v5158_v29 = vadd.f32 %v5157_v9, %v1275_v46  ;;  %v4295_v25 = vpop.f32.mrb[41].mxu0 }
 0x26d   : > { %v1302_v40 = vmul.f32 0.6931472, %v5638_v20  ;;  %1361 = vperm.xlu1 %5593, %v1318_v8  }
 0x26e   : > { %5643 = vlog2.f32 %v5158_v29 }
 0x26f   : > { %v1281_v60 = vpop.f32.mrb[42].mxu0  ;;  %v1319_v36 = vadd.f32 %v1302_v40, %v6085_v42  ;;  %v262_v40 = vld [vmem:[%s5997_s8 + $0x20] sm:$0xff] }
 0x270   : > { %v5640_v41 = vpop.eup %5639  ;;  %v5161_v34 = vadd.f32 %v5160_v16, %v1281_v60  ;;  %v4298_v56 = vpop.f32.mrb[43].mxu0 }
 0x271   : > { %v1304_v50 = vmul.f32 0.6931472, %v5640_v41  ;;  %1366 = vperm.xlu1 %5593, %v1319_v36   ;;  %v5651_v56 = vld [vmem:[%s5991_s7 + $0x20] sm:$0xff] }
 0x272   : > { %5645 = vlog2.f32 %v5161_v34 }
 0x273   : > { %v1320_v44 = vadd.f32 %v1304_v50, %v6097_v49  ;;  %v258_v49 = vld [vmem:[%s5997_s8] sm:$0xff] }
 0x274   : > { %v5642_v35 = vpop.eup %5641 }
 0x275   : > { %v1306_v47 = vmul.f32 0.6931472, %v5642_v35  ;;  %1371 = vperm.xlu1 %5593, %v1320_v44  }
 0x277   : > { %v1321_v9 = vadd.f32 %v1306_v47, %v6125_v3  ;;  %v259_v3 = vld [vmem:[%s5997_s8 + $0x8] sm:$0xff] }
 0x278   : > { %v5644_v53 = vpop.eup %5643 }
 0x279   : > { %v1308_v52 = vmul.f32 0.6931472, %v5644_v53  ;;  %1376 = vperm.xlu0 %5594, %v1321_v9  }
 0x27b   : > { %v1322_v42 = vadd.f32 %v1308_v52, %v6149_v18 }
 0x27c   : > { %v5646_v61 = vpop.eup %5645 }
 0x27d   : > { %v1310_v63 = vmul.f32 0.6931472, %v5646_v61  ;;  %1381 = vperm.xlu1 %5593, %v1322_v42   ;;  %v263_v61 = vld [vmem:[%s5997_s8 + $0x28] sm:$0xff] }
 0x27f   : > { %v1323_v54 = vadd.f32 %v1310_v63, %v6170_v30 }
 0x281   : > { %1386 = vperm.xlu0 %5594, %v1323_v54  }
 0x2d0   : > { %v1327_v11 = vpop.permute.xlu1 %1326 }
 0x2d1   : > { %v1389_v62 = vsub.f32 %v1327_v11, %v5647_v31 }
 0x2d3   : > { %v1402_v16 = vmul.f32 %v1389_v62, %v258_v49  ;;  %v6553_v33 = vand.u32 4294901760, %v1389_v62 }
 0x2d4   : > { %v1332_v59 = vpop.permute.xlu0 %1331 }
 0x2d5   : > { %v6556_v2 = vand.u32 4294901760, %v1402_v16  ;;  %v6559_v18 = vsub.f32 %v1389_v62, %v6553_v33  ;;  %v1390_v55 = vsub.f32 %v1332_v59, %v5648_v39  ;;  %v5652_v62 = vld [vmem:[%s5991_s7 + $0x28] sm:$0xff] }
 0x2d7   : > { %v6563_v30 = vsub.f32 %v1402_v16, %v6556_v2  ;;  %v7475_v10 = vand.u32 4294901760, %v6559_v18  ;;  %v1403_v43 = vmul.f32 %v1390_v55, %v259_v3  ;;  %v6566_v21 = vand.u32 4294901760, %v1390_v55 }
 0x2d8   : > { %v1337_v22 = vpop.permute.xlu1 %1336 }
 0x2d9   : > { %v7474_v7 = vand.u32 4294901760, %v6563_v30  ;;  %v2432_v4 = vsub.f32 %v6559_v18, %v7475_v10  ;;  %v6572_v6 = vand.u32 4294901760, %v1403_v43  ;;  %v6575_v27 = vsub.f32 %v1390_v55, %v6566_v21 }
 0x2da   : > { %v1391_v24 = vsub.f32 %v1337_v22, %v5649_v19 }
 0x2db   : > { %v1483_v17 = vsub.f32 %v6563_v30, %v7474_v7  ;;  %v2433_v32 = vand.u32 4294901760, %v2432_v4  ;;  %v6583_v26 = vsub.f32 %v1403_v43, %v6572_v6  ;;  %v7472_v13 = vand.u32 4294901760, %v6575_v27 }
 0x2dc   : > { %v1404_v37 = vmul.f32 %v1391_v24, %v260_v51  ;;  %v6586_v14 = vand.u32 4294901760, %v1391_v24  ;;  %v1342_v45 = vpop.permute.xlu1 %1341  ;;  %v264_v51 = vld [vmem:[%s5997_s8 + $0x30] sm:$0xff] }
 0x2dd   : > { %v1392_v38 = vsub.f32 %v1342_v45, %v5650_v57  ;;  %4668 = vmatmul.mubr.f32.vlgmr.msra.gmra.mrb[44].mxu0 %v2433_v32  ;;  %v1484_v48 = vand.u32 4294901760, %v1483_v17  ;;  %v2442_v58 = vsub.f32 %v6575_v27, %v7472_v13  ;;  %v7470_v28 = vand.u32 4294901760, %v6583_v26 }
 0x2de   : > { %v6594_v5 = vand.u32 4294901760, %v1404_v37  ;;  %v6597_v12 = vsub.f32 %v1391_v24, %v6586_v14  ;;  %4707 = vmatpush3.msra.mxu0 %v5835_v15  ;;  %4670 = vmatprep.mubr.msk.f32.mxu0 %vm5836_vm0, %v5835_v15 }
 0x2df   : > { %v1405_v46 = vmul.f32 %v1392_v38, %v261_v23  ;;  %v6602_v8 = vand.u32 4294901760, %v1392_v38  ;;  %4332 = vmatmul.mubr.f32.vlgmr.msra.gmra.mrb[44].mxu1 %v1484_v48  ;;  %v2443_v20 = vand.u32 4294901760, %v2442_v58  ;;  %v1493_v29 = vsub.f32 %v6583_v26, %v7470_v28  ;;  %4747 = vmatprep.subr.mxu0 %v5835_v15  ;;  %v5653_v23 = vld [vmem:[%s5991_s7 + $0x30] sm:$0xff] }
 0x2e0   : > { %v6609_v25 = vsub.f32 %v1404_v37, %v6594_v5  ;;  %4371 = vmatpush3.msra.mxu1 %v5835_v15  ;;  %v1347_v60 = vpop.permute.xlu1 %1346  ;;  %4334 = vmatprep.mubr.msk.f32.mxu1 %vm5836_vm0, %v5835_v15  ;;  %v7469_v36 = vand.u32 4294901760, %v6597_v12 }
 0x2e1   : > { %v6616_v41 = vand.u32 4294901760, %v1405_v46  ;;  %v6619_v34 = vsub.f32 %v1392_v38, %v6602_v8  ;;  %v1393_v50 = vsub.f32 %v1347_v60, %v5651_v56  ;;  %4671 = vmatmul.mubr.f32.gmra.mrb[46].mxu0 %v2443_v20  ;;  %v1494_v44 = vand.u32 4294901760, %v1493_v29  ;;  %4411 = vmatprep.subr.mxu1 %v5835_v15 }
 0x2e2   : > { %4673 = vmatprep.mubr.msk.f32.mxu0 %vm5836_vm0, %v5835_v15  ;;  %v2452_v35 = vsub.f32 %v6597_v12, %v7469_v36  ;;  %v7468_v47 = vand.u32 4294901760, %v6609_v25 }
 0x2e3   : > { %v6630_v9 = vsub.f32 %v1405_v46, %v6616_v41  ;;  %v1406_v53 = vmul.f32 %v1393_v50, %v262_v40  ;;  %v6632_v52 = vand.u32 4294901760, %v1393_v50  ;;  %4335 = vmatmul.mubr.f32.gmra.mrb[46].mxu1 %v1494_v44  ;;  %v7466_v42 = vand.u32 4294901760, %v6619_v34  ;;  %v265_v40 = vld [vmem:[%s5997_s8 + $0x38] sm:$0xff] }
 0x2e4   : > { %v1352_v63 = vpop.permute.xlu1 %1351  ;;  %v2453_v54 = vand.u32 4294901760, %v2452_v35  ;;  %4337 = vmatprep.mubr.msk.f32.mxu1 %vm5836_vm0, %v5835_v15  ;;  %v1503_v49 = vsub.f32 %v6609_v25, %v7468_v47 }
 0x2e5   : > { %v6641_v11 = vand.u32 4294901760, %v1406_v53  ;;  %v6644_v31 = vsub.f32 %v1393_v50, %v6632_v52  ;;  %v1394_v16 = vsub.f32 %v1352_v63, %v5652_v62  ;;  %v2462_v3 = vsub.f32 %v6619_v34, %v7466_v42 }
 0x2e6   : > { %4674 = vmatmul.mubr.f32.gmra.mrb[48].mxu0 %v2453_v54  ;;  %v1504_v59 = vand.u32 4294901760, %v1503_v49  ;;  %v7465_v39 = vand.u32 4294901760, %v6630_v9 }
 0x2e7   : > { %v6652_v55 = vsub.f32 %v1406_v53, %v6641_v11  ;;  %v1407_v43 = vmul.f32 %v1394_v16, %v263_v61  ;;  %v6654_v22 = vand.u32 4294901760, %v1394_v16  ;;  %4676 = vmatprep.mubr.msk.f32.mxu0 %vm5836_vm0, %v5835_v15  ;;  %v2463_v4 = vand.u32 4294901760, %v2462_v3  ;;  %v5654_v53 = vld [vmem:[%s5991_s7 + $0x38] sm:$0xff] }
 0x2e8   : > { %4338 = vmatmul.mubr.f32.gmra.mrb[48].mxu1 %v1504_v59  ;;  %v1357_v19 = vpop.permute.xlu1 %1356  ;;  %v1513_v24 = vsub.f32 %v6630_v9, %v7465_v39  ;;  %v7463_v17 = vand.u32 4294901760, %v6644_v31 }
 0x2e9   : > { %v6663_v32 = vand.u32 4294901760, %v1407_v43  ;;  %v6666_v37 = vsub.f32 %v1394_v16, %v6654_v22  ;;  %v1395_v45 = vsub.f32 %v1357_v19, %v5653_v23  ;;  %4340 = vmatprep.mubr.msk.f32.mxu1 %vm5836_vm0, %v5835_v15  ;;  %v7461_v57 = vand.u32 4294901760, %v6652_v55 }
 0x2ea   : > { %4677 = vmatmul.mubr.f32.gmra.mrb[50].mxu0 %v2463_v4  ;;  %v1514_v38 = vand.u32 4294901760, %v1513_v24  ;;  %v2472_v48 = vsub.f32 %v6644_v31, %v7463_v17 }
 0x2eb   : > { %v6676_v58 = vsub.f32 %v1407_v43, %v6663_v32  ;;  %v1408_v46 = vmul.f32 %v1395_v45, %v264_v51  ;;  %v6678_v20 = vand.u32 4294901760, %v1395_v45  ;;  %4679 = vmatprep.mubr.msk.f32.mxu0 %vm5836_vm0, %v5835_v15  ;;  %v1523_v29 = vsub.f32 %v6652_v55, %v7461_v57  ;;  %v266_v43 = vld [vmem:[%s5997_s8 + $0x40] sm:$0xff] }
 0x2ec   : > { %4341 = vmatmul.mubr.f32.gmra.mrb[50].mxu1 %v1514_v38  ;;  %v1362_v60 = vpop.permute.xlu1 %1361  ;;  %v2473_v56 = vand.u32 4294901760, %v2472_v48  ;;  %v7460_v50 = vand.u32 4294901760, %v6666_v37 }
 0x2ed   : > { %v6687_v44 = vand.u32 4294901760, %v1408_v46  ;;  %v6690_v35 = vsub.f32 %v1395_v45, %v6678_v20  ;;  %v1396_v61 = vsub.f32 %v1362_v60, %v5654_v53  ;;  %4343 = vmatprep.mubr.msk.f32.mxu1 %vm5836_vm0, %v5835_v15  ;;  %v1524_v63 = vand.u32 4294901760, %v1523_v29  ;;  %v5655_v45 = vld [vmem:[%s5991_s7 + $0x40] sm:$0xff] }
 0x2ee   : > { %4680 = vmatmul.mubr.f32.gmra.mrb[52].mxu0 %v2473_v56  ;;  %v2482_v54 = vsub.f32 %v6666_v37, %v7460_v50  ;;  %v7458_v49 = vand.u32 4294901760, %v6676_v58 }
 0x2ef   : > { %v6700_v62 = vsub.f32 %v1408_v46, %v6687_v44  ;;  %v1409_v16 = vmul.f32 %v1396_v61, %v265_v40  ;;  %v6702_v3 = vand.u32 4294901760, %v1396_v61  ;;  %4682 = vmatprep.mubr.msk.f32.mxu0 %vm5836_vm0, %v5835_v15  ;;  %v7457_v59 = vand.u32 4294901760, %v6690_v35 }
 0x2f0   : > { %4344 = vmatmul.mubr.f32.gmra.mrb[52].mxu1 %v1524_v63  ;;  %v1367_v4 = vpop.permute.xlu1 %1366  ;;  %v2483_v51 = vand.u32 4294901760, %v2482_v54  ;;  %v1533_v19 = vsub.f32 %v6676_v58, %v7458_v49 }
 0x2f1   : > { %v6711_v24 = vand.u32 4294901760, %v1409_v16  ;;  %v6714_v23 = vsub.f32 %v1396_v61, %v6702_v3  ;;  %v1397_v38 = vsub.f32 %v1367_v4, %v5655_v45  ;;  %4346 = vmatprep.mubr.msk.f32.mxu1 %vm5836_vm0, %v5835_v15  ;;  %v2492_v48 = vsub.f32 %v6690_v35, %v7457_v59  ;;  %v267_v61 = vld [vmem:[%s5997_s8 + $0x48] sm:$0xff] }
 0x2f2   : > { %4683 = vmatmul.mubr.f32.gmra.mrb[54].mxu0 %v2483_v51  ;;  %v1534_v46 = vand.u32 4294901760, %v1533_v19  ;;  %v7456_v29 = vand.u32 4294901760, %v6700_v62 }
 0x2f3   : > { %v6724_v40 = vsub.f32 %v1409_v16, %v6711_v24  ;;  %v1410_v60 = vmul.f32 %v1397_v38, %v266_v43  ;;  %v6726_v56 = vand.u32 4294901760, %v1397_v38  ;;  %4685 = vmatprep.mubr.msk.f32.mxu0 %vm5836_vm0, %v5835_v15  ;;  %v2493_v53 = vand.u32 4294901760, %v2492_v48  ;;  %v5656_v43 = vld [vmem:[%s5991_s7 + $0x48] sm:$0xff] }
 0x2f4   : > { %4347 = vmatmul.mubr.f32.gmra.mrb[54].mxu1 %v1534_v46  ;;  %v1372_v63 = vpop.permute.xlu1 %1371  ;;  %v1543_v54 = vsub.f32 %v6700_v62, %v7456_v29  ;;  %v7459_v4 = vand.u32 4294901760, %v6714_v23 }
 0x2f5   : > { %v6735_v51 = vand.u32 4294901760, %v1410_v60  ;;  %v6738_v16 = vsub.f32 %v1397_v38, %v6726_v56  ;;  %v1398_v19 = vsub.f32 %v1372_v63, %v5656_v43  ;;  %4349 = vmatprep.mubr.msk.f32.mxu1 %vm5836_vm0, %v5835_v15  ;;  %v7462_v45 = vand.u32 4294901760, %v6724_v40 }
 0x2f6   : > { %4686 = vmatmul.mubr.f32.gmra.mrb[56].mxu0 %v2493_v53  ;;  %v1544_v48 = vand.u32 4294901760, %v1543_v54  ;;  %v2502_v46 = vsub.f32 %v6714_v23, %v7459_v4  ;;  %v268_v53 = vld [vmem:[%s5997_s8 + $0x50] sm:$0xff] }
 0x2f7   : > { %v6748_v29 = vsub.f32 %v1410_v60, %v6735_v51  ;;  %v1411_v59 = vmul.f32 %v1398_v19, %v267_v61  ;;  %v6750_v38 = vand.u32 4294901760, %v1398_v19  ;;  %4688 = vmatprep.mubr.msk.f32.mxu0 %vm5836_vm0, %v5835_v15  ;;  %v1553_v63 = vsub.f32 %v6724_v40, %v7462_v45  ;;  %v5657_v61 = vld [vmem:[%s5991_s7 + $0x50] sm:$0xff] }
 0x2f8   : > { %4350 = vmatmul.mubr.f32.gmra.mrb[56].mxu1 %v1544_v48  ;;  %v1377_v54 = vpop.permute.xlu0 %1376  ;;  %v2503_v43 = vand.u32 4294901760, %v2502_v46  ;;  %v7464_v49 = vand.u32 4294901760, %v6738_v16 }
 0x2f9   : > { %v6759_v4 = vand.u32 4294901760, %v1411_v59  ;;  %v6762_v60 = vsub.f32 %v1398_v19, %v6750_v38  ;;  %v1399_v50 = vsub.f32 %v1377_v54, %v5657_v61  ;;  %4352 = vmatprep.mubr.msk.f32.mxu1 %vm5836_vm0, %v5835_v15  ;;  %v1554_v57 = vand.u32 4294901760, %v1553_v63  ;;  %v269_v63 = vld [vmem:[%s5997_s8 + $0x58] sm:$0xff] }
 0x2fa   : > { %4689 = vmatmul.mubr.f32.gmra.mrb[58].mxu0 %v2503_v43  ;;  %v2512_v48 = vsub.f32 %v6738_v16, %v7464_v49  ;;  %v7467_v46 = vand.u32 4294901760, %v6748_v29 }
 0x2fb   : > { %v6772_v45 = vsub.f32 %v1411_v59, %v6759_v4  ;;  %v1412_v17 = vmul.f32 %v1399_v50, %v268_v53  ;;  %v6774_v19 = vand.u32 4294901760, %v1399_v50  ;;  %4691 = vmatprep.mubr.msk.f32.mxu0 %vm5836_vm0, %v5835_v15  ;;  %v7471_v54 = vand.u32 4294901760, %v6762_v60  ;;  %v5658_v53 = vld [vmem:[%s5991_s7 + $0x58] sm:$0xff] }
 0x2fc   : > { %4353 = vmatmul.mubr.f32.gmra.mrb[58].mxu1 %v1554_v57  ;;  %v1382_v43 = vpop.permute.xlu1 %1381  ;;  %v2513_v61 = vand.u32 4294901760, %v2512_v48  ;;  %v1563_v49 = vsub.f32 %v6748_v29, %v7467_v46 }
 0x2fd   : > { %v6783_v39 = vand.u32 4294901760, %v1412_v17  ;;  %v6786_v59 = vsub.f32 %v1399_v50, %v6774_v19  ;;  %v1400_v42 = vsub.f32 %v1382_v43, %v5658_v53  ;;  %4355 = vmatprep.mubr.msk.f32.mxu1 %vm5836_vm0, %v5835_v15  ;;  %v2522_v57 = vsub.f32 %v6762_v60, %v7471_v54  ;;  %v270_v53 = vld [vmem:[%s5997_s8 + $0x60] sm:$0xff] }
 0x2fe   : > { %4692 = vmatmul.mubr.f32.gmra.mrb[60].mxu0 %v2513_v61  ;;  %v1564_v48 = vand.u32 4294901760, %v1563_v49  ;;  %v7473_v46 = vand.u32 4294901760, %v6772_v45 }
 0x2ff   : > { %v6796_v47 = vsub.f32 %v1412_v17, %v6783_v39  ;;  %v1413_v36 = vmul.f32 %v1400_v42, %v269_v63  ;;  %v6798_v50 = vand.u32 4294901760, %v1400_v42  ;;  %4694 = vmatprep.mubr.msk.f32.mxu0 %vm5836_vm0, %v5835_v15  ;;  %v2523_v43 = vand.u32 4294901760, %v2522_v57  ;;  %v5659_v63 = vld [vmem:[%s5991_s7 + $0x60] sm:$0xff] }
 0x300   : > { %4356 = vmatmul.mubr.f32.gmra.mrb[60].mxu1 %v1564_v48  ;;  %v1387_v28 = vpop.permute.xlu0 %1386  ;;  %v1573_v61 = vsub.f32 %v6772_v45, %v7473_v46  ;;  %v7480_v49 = vand.u32 4294901760, %v6786_v59 }
 0x301   : > { %v6807_v54 = vand.u32 4294901760, %v1413_v36  ;;  %v6810_v17 = vsub.f32 %v1400_v42, %v6798_v50  ;;  %v1401_v13 = vsub.f32 %v1387_v28, %v5659_v63  ;;  %4358 = vmatprep.mubr.msk.f32.mxu1 %vm5836_vm0, %v5835_v15  ;;  %v7478_v57 = vand.u32 4294901760, %v6796_v47 }
 0x302   : > { %4695 = vmatmul.mubr.f32.gmra.mrb[62].mxu0 %v2523_v43  ;;  %v1574_v48 = vand.u32 4294901760, %v1573_v61  ;;  %v2532_v46 = vsub.f32 %v6786_v59, %v7480_v49 }
 0x303   : > { %v6820_v7 = vsub.f32 %v1413_v36, %v6807_v54  ;;  %v1414_v10 = vmul.f32 %v1401_v13, %v270_v53  ;;  %v6822_v1 = vand.u32 4294901760, %v1401_v13  ;;  %4697 = vmatprep.mubr.msk.f32.mxu0 %vm5836_vm0, %v5835_v15  ;;  %v1583_v28 = vsub.f32 %v6796_v47, %v7478_v57 }
 0x304   : > { %4359 = vmatmul.mubr.f32.gmra.mrb[62].mxu1 %v1574_v48  ;;  %v2533_v42 = vand.u32 4294901760, %v2532_v46  ;;  %v7479_v43 = vand.u32 4294901760, %v6810_v17 }
 0x305   : > { %v6830_v61 = vand.u32 4294901760, %v1414_v10  ;;  %v6833_v63 = vsub.f32 %v1401_v13, %v6822_v1  ;;  %4361 = vmatprep.mubr.msk.f32.mxu1 %vm5836_vm0, %v5835_v15  ;;  %v1584_v36 = vand.u32 4294901760, %v1583_v28  ;;  %v1592_v53 = vand.u32 4294901760, %v6820_v7 }
 0x306   : > { %4698 = vmatmul.mubr.f32.gmra.mrb[64].mxu0 %v2533_v42  ;;  %v2542_v57 = vsub.f32 %v6810_v17, %v7479_v43 }
 0x307   : > { %v6842_v46 = vsub.f32 %v1414_v10, %v6830_v61  ;;  %4700 = vmatprep.mubr.msk.f32.mxu0 %vm5836_vm0, %v5835_v15  ;;  %v1593_v13 = vsub.f32 %v6820_v7, %v1592_v53  ;;  %v2551_v48 = vand.u32 4294901760, %v6833_v63 }
 0x308   : > { %4362 = vmatmul.mubr.f32.gmra.mrb[64].mxu1 %v1584_v36  ;;  %v2543_v28 = vand.u32 4294901760, %v2542_v57 }
 0x309   : > { %4364 = vmatprep.mubr.msk.f32.mxu1 %vm5836_vm0, %v5835_v15  ;;  %v1594_v42 = vand.u32 4294901760, %v1593_v13  ;;  %v2552_v10 = vsub.f32 %v6833_v63, %v2551_v48  ;;  %v1602_v43 = vand.u32 4294901760, %v6842_v46  ;;  %v7490_v13 = vand.u32 4294901760, %v6559_v18 }
 0x30a   : > { %4701 = vmatmul.mubr.f32.gmra.mrb[66].mxu0 %v2543_v28  ;;  %v7491_v28 = vand.u32 4294901760, %v6563_v30 }
 0x30b   : > { %4703 = vmatprep.mubr.msk.f32.mxu0 %vm5836_vm0, %v5835_v15  ;;  %v2553_v49 = vand.u32 4294901760, %v2552_v10  ;;  %v1603_v36 = vsub.f32 %v6842_v46, %v1602_v43  ;;  %v7496_v10 = vand.u32 4294901760, %v6619_v34 }
 0x30c   : > { %4365 = vmatmul.mubr.f32.gmra.mrb[66].mxu1 %v1594_v42  ;;  %v7492_v42 = vand.u32 4294901760, %v6575_v27 }
 0x30d   : > { %4367 = vmatprep.mubr.msk.f32.mxu1 %vm5836_vm0, %v5835_v15  ;;  %v1604_v57 = vand.u32 4294901760, %v1603_v36 }
 0x30e   : > { %4704 = vmatmul.mubr.f32.gmra.mrb[68].mxu0 %v2553_v49  ;;  %v7489_v49 = vmov 1.0|1.0  }
 0x30f   : > { %4708 = vmatprep.mubr.msk.f32.mxu0 %vm5836_vm0, %v5835_v15 }
 0x310   : > { %4368 = vmatmul.mubr.f32.gmra.mrb[68].mxu1 %v1604_v57 }
 0x311   : > { %4372 = vmatprep.mubr.msk.f32.mxu1 %vm5836_vm0, %v5835_v15 }
 0x312   : > { %4709 = vmatmul.mubr.f32.vlgmr.msra.gmra.mrb[44].mxu0 %v6553_v33 }
 0x313   : > { %4748 = vmatpush3.msra.mxu0 %v5835_v15  ;;  %4711 = vmatprep.mubr.msk.f32.mxu0 %vm5836_vm0, %v5835_v15 }
 0x314   : > { %4373 = vmatmul.mubr.f32.vlgmr.msra.gmra.mrb[44].mxu1 %v6556_v2  ;;  %5083 = vmatprep.subr.bf16.mxu0 %v5833_v0 }
 0x315   : > { %4412 = vmatpush3.msra.mxu1 %v5835_v15  ;;  %4375 = vmatprep.mubr.msk.f32.mxu1 %vm5836_vm0, %v5835_v15 }
 0x316   : > { %4712 = vmatmul.mubr.f32.gmra.mrb[46].mxu0 %v6566_v21  ;;  %5035 = vmatprep.subr.bf16.mxu1 %v5833_v0 }
 0x317   : > { %4714 = vmatprep.mubr.msk.f32.mxu0 %vm5836_vm0, %v5835_v15 }
 0x318   : > { %4376 = vmatmul.mubr.f32.gmra.mrb[46].mxu1 %v6572_v6 }
 0x319   : > { %4378 = vmatprep.mubr.msk.f32.mxu1 %vm5836_vm0, %v5835_v15 }
 0x31a   : > { %4715 = vmatmul.mubr.f32.gmra.mrb[48].mxu0 %v6586_v14 }
 0x31b   : > { %4717 = vmatprep.mubr.msk.f32.mxu0 %vm5836_vm0, %v5835_v15 }
 0x31c   : > { %4379 = vmatmul.mubr.f32.gmra.mrb[48].mxu1 %v6594_v5 }
 0x31d   : > { %4381 = vmatprep.mubr.msk.f32.mxu1 %vm5836_vm0, %v5835_v15 }
 0x31e   : > { %4718 = vmatmul.mubr.f32.gmra.mrb[50].mxu0 %v6602_v8 }
 0x31f   : > { %4720 = vmatprep.mubr.msk.f32.mxu0 %vm5836_vm0, %v5835_v15 }
 0x320   : > { %4382 = vmatmul.mubr.f32.gmra.mrb[50].mxu1 %v6616_v41 }
 0x321   : > { %4384 = vmatprep.mubr.msk.f32.mxu1 %vm5836_vm0, %v5835_v15 }
 0x322   : > { %4721 = vmatmul.mubr.f32.gmra.mrb[52].mxu0 %v6632_v52 }
 0x323   : > { %4723 = vmatprep.mubr.msk.f32.mxu0 %vm5836_vm0, %v5835_v15 }
 0x324   : > { %4385 = vmatmul.mubr.f32.gmra.mrb[52].mxu1 %v6641_v11 }
 0x325   : > { %4387 = vmatprep.mubr.msk.f32.mxu1 %vm5836_vm0, %v5835_v15 }
 0x326   : > { %4724 = vmatmul.mubr.f32.gmra.mrb[54].mxu0 %v6654_v22 }
 0x327   : > { %4726 = vmatprep.mubr.msk.f32.mxu0 %vm5836_vm0, %v5835_v15 }
 0x328   : > { %4388 = vmatmul.mubr.f32.gmra.mrb[54].mxu1 %v6663_v32 }
 0x329   : > { %4390 = vmatprep.mubr.msk.f32.mxu1 %vm5836_vm0, %v5835_v15 }
 0x32a   : > { %4727 = vmatmul.mubr.f32.gmra.mrb[56].mxu0 %v6678_v20 }
 0x32b   : > { %4729 = vmatprep.mubr.msk.f32.mxu0 %vm5836_vm0, %v5835_v15 }
 0x32c   : > { %4391 = vmatmul.mubr.f32.gmra.mrb[56].mxu1 %v6687_v44 }
 0x32d   : > { %4393 = vmatprep.mubr.msk.f32.mxu1 %vm5836_vm0, %v5835_v15 }
 0x32e   : > { %4730 = vmatmul.mubr.f32.gmra.mrb[58].mxu0 %v6702_v3 }
 0x32f   : > { %4732 = vmatprep.mubr.msk.f32.mxu0 %vm5836_vm0, %v5835_v15 }
 0x330   : > { %4394 = vmatmul.mubr.f32.gmra.mrb[58].mxu1 %v6711_v24 }
 0x331   : > { %4396 = vmatprep.mubr.msk.f32.mxu1 %vm5836_vm0, %v5835_v15 }
 0x332   : > { %4733 = vmatmul.mubr.f32.gmra.mrb[60].mxu0 %v6726_v56 }
 0x333   : > { %4735 = vmatprep.mubr.msk.f32.mxu0 %vm5836_vm0, %v5835_v15 }
 0x334   : > { %4397 = vmatmul.mubr.f32.gmra.mrb[60].mxu1 %v6735_v51 }
 0x335   : > { %4399 = vmatprep.mubr.msk.f32.mxu1 %vm5836_vm0, %v5835_v15 }
 0x336   : > { %4736 = vmatmul.mubr.f32.gmra.mrb[62].mxu0 %v6750_v38 }
 0x337   : > { %4738 = vmatprep.mubr.msk.f32.mxu0 %vm5836_vm0, %v5835_v15 }
 0x338   : > { %4400 = vmatmul.mubr.f32.gmra.mrb[62].mxu1 %v6759_v4 }
 0x339   : > { %4402 = vmatprep.mubr.msk.f32.mxu1 %vm5836_vm0, %v5835_v15 }
 0x33a   : > { %4739 = vmatmul.mubr.f32.gmra.mrb[64].mxu0 %v6774_v19 }
 0x33b   : > { %4741 = vmatprep.mubr.msk.f32.mxu0 %vm5836_vm0, %v5835_v15 }
 0x33c   : > { %4403 = vmatmul.mubr.f32.gmra.mrb[64].mxu1 %v6783_v39 }
 0x33d   : > { %4405 = vmatprep.mubr.msk.f32.mxu1 %vm5836_vm0, %v5835_v15 }
 0x33e   : > { %4742 = vmatmul.mubr.f32.gmra.mrb[66].mxu0 %v6798_v50 }
 0x33f   : > { %4744 = vmatprep.mubr.msk.f32.mxu0 %vm5836_vm0, %v5835_v15 }
 0x340   : > { %4406 = vmatmul.mubr.f32.gmra.mrb[66].mxu1 %v6807_v54 }
 0x341   : > { %4408 = vmatprep.mubr.msk.f32.mxu1 %vm5836_vm0, %v5835_v15 }
 0x342   : > { %4745 = vmatmul.mubr.f32.gmra.mrb[68].mxu0 %v6822_v1 }
 0x343   : > { %4749 = vmatprep.mubr.msk.f32.mxu0 %vm5836_vm0, %v5835_v15 }
 0x344   : > { %4409 = vmatmul.mubr.f32.gmra.mrb[68].mxu1 %v6830_v61 }
 0x345   : > { %4413 = vmatprep.mubr.msk.f32.mxu1 %vm5836_vm0, %v5835_v15 }
 0x346   : > { %4750 = vmatmul.mubr.f32.vlgmr.msra.gmra.mrb[44].mxu0 %v6559_v18  ;;  %v7493_v18 = vand.u32 4294901760, %v6583_v26 }
 0x347   : > { %5084 = vmatpush3.bf16.msra.mxu0 %v7489_v49  ;;  %4752 = vmatprep.mubr.msk.f32.mxu0 %vm5836_vm0, %v5835_v15 }
 0x348   : > { %4414 = vmatmul.mubr.f32.vlgmr.msra.gmra.mrb[44].mxu1 %v6563_v30  ;;  %5085 = vmatprep.subr.bf16.mxu0 %v5833_v0  ;;  %v7494_v30 = vand.u32 4294901760, %v6597_v12 }
 0x349   : > { %5036 = vmatpush3.bf16.msra.mxu1 %v7489_v49  ;;  %4416 = vmatprep.mubr.msk.f32.mxu1 %vm5836_vm0, %v5835_v15 }
 0x34a   : > { %4753 = vmatmul.mubr.f32.gmra.mrb[46].mxu0 %v6575_v27  ;;  %5037 = vmatprep.subr.bf16.mxu1 %v5833_v0  ;;  %v7495_v27 = vand.u32 4294901760, %v6609_v25 }
 0x34b   : > { %4755 = vmatprep.mubr.msk.f32.mxu0 %vm5836_vm0, %v5835_v15  ;;  %5086 = vmatpush3.bf16.msra.mxu0 %v7489_v49 }
 0x34c   : > { %4417 = vmatmul.mubr.f32.gmra.mrb[46].mxu1 %v6583_v26  ;;  %5087 = vmatprep.subr.bf16.mxu0 %v5833_v0  ;;  %v7497_v26 = vand.u32 4294901760, %v6630_v9 }
 0x34d   : > { %4419 = vmatprep.mubr.msk.f32.mxu1 %vm5836_vm0, %v5835_v15  ;;  %5038 = vmatpush3.bf16.msra.mxu1 %v7489_v49 }
 0x34e   : > { %4756 = vmatmul.mubr.f32.gmra.mrb[48].mxu0 %v6597_v12  ;;  %5039 = vmatprep.subr.bf16.mxu1 %v5833_v0  ;;  %v7498_v12 = vand.u32 4294901760, %v6644_v31 }
 0x34f   : > { %4758 = vmatprep.mubr.msk.f32.mxu0 %vm5836_vm0, %v5835_v15  ;;  %5088 = vmatpush3.bf16.msra.mxu0 %v7489_v49 }
 0x350   : > { %4420 = vmatmul.mubr.f32.gmra.mrb[48].mxu1 %v6609_v25  ;;  %5089 = vmatprep.subr.bf16.mxu0 %v5833_v0  ;;  %v7499_v25 = vand.u32 4294901760, %v6652_v55 }
 0x351   : > { %4422 = vmatprep.mubr.msk.f32.mxu1 %vm5836_vm0, %v5835_v15  ;;  %5040 = vmatpush3.bf16.msra.mxu1 %v7489_v49 }
 0x352   : > { %4759 = vmatmul.mubr.f32.gmra.mrb[50].mxu0 %v6619_v34  ;;  %5041 = vmatprep.subr.bf16.mxu1 %v5833_v0  ;;  %v7500_v34 = vand.u32 4294901760, %v6666_v37 }
 0x353   : > { %4761 = vmatprep.mubr.msk.f32.mxu0 %vm5836_vm0, %v5835_v15  ;;  %5090 = vmatpush3.bf16.msra.mxu0 %v7489_v49 }
 0x354   : > { %4423 = vmatmul.mubr.f32.gmra.mrb[50].mxu1 %v6630_v9  ;;  %5091 = vmatprep.subr.bf16.mxu0 %v5833_v0  ;;  %v7501_v9 = vand.u32 4294901760, %v6676_v58 }
 0x355   : > { %4425 = vmatprep.mubr.msk.f32.mxu1 %vm5836_vm0, %v5835_v15  ;;  %5042 = vmatpush3.bf16.msra.mxu1 %v7489_v49 }
 0x356   : > { %4762 = vmatmul.mubr.f32.gmra.mrb[52].mxu0 %v6644_v31  ;;  %5043 = vmatprep.subr.bf16.mxu1 %v5833_v0  ;;  %v7502_v31 = vand.u32 4294901760, %v6690_v35 }
 0x357   : > { %4764 = vmatprep.mubr.msk.f32.mxu0 %vm5836_vm0, %v5835_v15  ;;  %5092 = vmatpush3.bf16.msra.mxu0 %v7489_v49 }
 0x358   : > { %4426 = vmatmul.mubr.f32.gmra.mrb[52].mxu1 %v6652_v55  ;;  %5093 = vmatprep.subr.bf16.mxu0 %v5833_v0  ;;  %v7503_v55 = vand.u32 4294901760, %v6700_v62 }
 0x359   : > { %4428 = vmatprep.mubr.msk.f32.mxu1 %vm5836_vm0, %v5835_v15  ;;  %5044 = vmatpush3.bf16.msra.mxu1 %v7489_v49 }
 0x35a   : > { %4765 = vmatmul.mubr.f32.gmra.mrb[54].mxu0 %v6666_v37  ;;  %5045 = vmatprep.subr.bf16.mxu1 %v5833_v0  ;;  %v7504_v37 = vand.u32 4294901760, %v6714_v23 }
 0x35b   : > { %4767 = vmatprep.mubr.msk.f32.mxu0 %vm5836_vm0, %v5835_v15  ;;  %5094 = vmatpush3.bf16.msra.mxu0 %v7489_v49 }
 0x35c   : > { %4429 = vmatmul.mubr.f32.gmra.mrb[54].mxu1 %v6676_v58  ;;  %5095 = vmatprep.subr.bf16.mxu0 %v5833_v0  ;;  %v7505_v58 = vand.u32 4294901760, %v6724_v40 }
 0x35d   : > { %4431 = vmatprep.mubr.msk.f32.mxu1 %vm5836_vm0, %v5835_v15  ;;  %5046 = vmatpush3.bf16.msra.mxu1 %v7489_v49 }
 0x35e   : > { %4768 = vmatmul.mubr.f32.gmra.mrb[56].mxu0 %v6690_v35  ;;  %5047 = vmatprep.subr.bf16.mxu1 %v5833_v0  ;;  %v7506_v35 = vand.u32 4294901760, %v6738_v16 }
 0x35f   : > { %4770 = vmatprep.mubr.msk.f32.mxu0 %vm5836_vm0, %v5835_v15  ;;  %5096 = vmatpush3.bf16.msra.mxu0 %v7489_v49 }
 0x360   : > { %4432 = vmatmul.mubr.f32.gmra.mrb[56].mxu1 %v6700_v62  ;;  %5097 = vmatprep.subr.bf16.mxu0 %v5833_v0  ;;  %v7507_v62 = vand.u32 4294901760, %v6748_v29 }
 0x361   : > { %4434 = vmatprep.mubr.msk.f32.mxu1 %vm5836_vm0, %v5835_v15  ;;  %5048 = vmatpush3.bf16.msra.mxu1 %v7489_v49 }
 0x362   : > { %4771 = vmatmul.mubr.f32.gmra.mrb[58].mxu0 %v6714_v23  ;;  %5049 = vmatprep.subr.bf16.mxu1 %v5833_v0  ;;  %v7508_v23 = vand.u32 4294901760, %v6762_v60 }
 0x363   : > { %4773 = vmatprep.mubr.msk.f32.mxu0 %vm5836_vm0, %v5835_v15  ;;  %5098 = vmatpush3.bf16.msra.mxu0 %v7489_v49 }
 0x364   : > { %4435 = vmatmul.mubr.f32.gmra.mrb[58].mxu1 %v6724_v40  ;;  %4859 = vmatprep.subr.mxu0 %v5835_v15  ;;  %v7509_v40 = vand.u32 4294901760, %v6772_v45 }
 0x365   : > { %4437 = vmatprep.mubr.msk.f32.mxu1 %vm5836_vm0, %v5835_v15  ;;  %5050 = vmatpush3.bf16.msra.mxu1 %v7489_v49 }
 0x366   : > { %4774 = vmatmul.mubr.f32.gmra.mrb[60].mxu0 %v6738_v16  ;;  %4523 = vmatprep.subr.mxu1 %v5835_v15  ;;  %v7510_v16 = vand.u32 4294901760, %v6786_v59 }
 0x367   : > { %4776 = vmatprep.mubr.msk.f32.mxu0 %vm5836_vm0, %v5835_v15 }
 0x368   : > { %4438 = vmatmul.mubr.f32.gmra.mrb[60].mxu1 %v6748_v29  ;;  %v7511_v29 = vand.u32 4294901760, %v6796_v47 }
 0x369   : > { %4440 = vmatprep.mubr.msk.f32.mxu1 %vm5836_vm0, %v5835_v15 }
 0x36a   : > { %4777 = vmatmul.mubr.f32.gmra.mrb[62].mxu0 %v6762_v60  ;;  %v7512_v60 = vand.u32 4294901760, %v6810_v17 }
 0x36b   : > { %4779 = vmatprep.mubr.msk.f32.mxu0 %vm5836_vm0, %v5835_v15 }
 0x36c   : > { %4441 = vmatmul.mubr.f32.gmra.mrb[62].mxu1 %v6772_v45 }
 0x36d   : > { %4443 = vmatprep.mubr.msk.f32.mxu1 %vm5836_vm0, %v5835_v15 }
 0x36e   : > { %4780 = vmatmul.mubr.f32.gmra.mrb[64].mxu0 %v6786_v59 }
 0x36f   : > { %4782 = vmatprep.mubr.msk.f32.mxu0 %vm5836_vm0, %v5835_v15 }
 0x370   : > { %4444 = vmatmul.mubr.f32.gmra.mrb[64].mxu1 %v6796_v47 }
 0x371   : > { %4446 = vmatprep.mubr.msk.f32.mxu1 %vm5836_vm0, %v5835_v15 }
 0x372   : > { %4783 = vmatmul.mubr.f32.gmra.mrb[66].mxu0 %v6810_v17 }
 0x373   : > { %4785 = vmatprep.mubr.msk.f32.mxu0 %vm5836_vm0, %v5835_v15 }
 0x374   : > { %4447 = vmatmul.mubr.f32.gmra.mrb[66].mxu1 %v6820_v7 }
 0x375   : > { %4449 = vmatprep.mubr.msk.f32.mxu1 %vm5836_vm0, %v5835_v15 }
 0x376   : > { %4786 = vmatmul.mubr.f32.gmra.mrb[68].mxu0 %v6833_v63 }
 0x377   : > { %4820 = vmatprep.mubr.msk.f32.mxu0 %vm5836_vm0, %v5835_v15 }
 0x378   : > { %4450 = vmatmul.mubr.f32.gmra.mrb[68].mxu1 %v6842_v46 }
 0x379   : > { %4484 = vmatprep.mubr.msk.f32.mxu1 %vm5836_vm0, %v5835_v15 }
 0x37a   : > { %4821 = vmatmul.mubr.f32.vlgmr.msra.gmra.mrb[44].mxu0 %v7490_v13 }
 0x37b   : > { %4860 = vmatpush3.msra.mxu0 %v5835_v15  ;;  %4823 = vmatprep.mubr.msk.f32.mxu0 %vm5836_vm0, %v5835_v15 }
 0x37c   : > { %4485 = vmatmul.mubr.f32.vlgmr.msra.gmra.mrb[44].mxu1 %v7491_v28  ;;  %5099 = vmatprep.subr.bf16.mxu0 %v5833_v0 }
 0x37d   : > { %4524 = vmatpush3.msra.mxu1 %v5835_v15  ;;  %4487 = vmatprep.mubr.msk.f32.mxu1 %vm5836_vm0, %v5835_v15 }
 0x37e   : > { %4824 = vmatmul.mubr.f32.gmra.mrb[46].mxu0 %v7492_v42  ;;  %5051 = vmatprep.subr.bf16.mxu1 %v5833_v0 }
 0x37f   : > { %4826 = vmatprep.mubr.msk.f32.mxu0 %vm5836_vm0, %v5835_v15 }
 0x380   : > { %4488 = vmatmul.mubr.f32.gmra.mrb[46].mxu1 %v7493_v18 }
 0x381   : > { %4490 = vmatprep.mubr.msk.f32.mxu1 %vm5836_vm0, %v5835_v15 }
 0x382   : > { %4827 = vmatmul.mubr.f32.gmra.mrb[48].mxu0 %v7494_v30 }
 0x383   : > { %4829 = vmatprep.mubr.msk.f32.mxu0 %vm5836_vm0, %v5835_v15 }
 0x384   : > { %4491 = vmatmul.mubr.f32.gmra.mrb[48].mxu1 %v7495_v27 }
 0x385   : > { %4493 = vmatprep.mubr.msk.f32.mxu1 %vm5836_vm0, %v5835_v15 }
 0x386   : > { %4830 = vmatmul.mubr.f32.gmra.mrb[50].mxu0 %v7496_v10 }
 0x387   : > { %4832 = vmatprep.mubr.msk.f32.mxu0 %vm5836_vm0, %v5835_v15 }
 0x388   : > { %4494 = vmatmul.mubr.f32.gmra.mrb[50].mxu1 %v7497_v26 }
 0x389   : > { %4496 = vmatprep.mubr.msk.f32.mxu1 %vm5836_vm0, %v5835_v15 }
 0x38a   : > { %4833 = vmatmul.mubr.f32.gmra.mrb[52].mxu0 %v7498_v12 }
 0x38b   : > { %4835 = vmatprep.mubr.msk.f32.mxu0 %vm5836_vm0, %v5835_v15 }
 0x38c   : > { %4497 = vmatmul.mubr.f32.gmra.mrb[52].mxu1 %v7499_v25 }
 0x38d   : > { %4499 = vmatprep.mubr.msk.f32.mxu1 %vm5836_vm0, %v5835_v15 }
 0x38e   : > { %4836 = vmatmul.mubr.f32.gmra.mrb[54].mxu0 %v7500_v34 }
 0x38f   : > { %4838 = vmatprep.mubr.msk.f32.mxu0 %vm5836_vm0, %v5835_v15 }
 0x390   : > { %4500 = vmatmul.mubr.f32.gmra.mrb[54].mxu1 %v7501_v9 }
 0x391   : > { %4502 = vmatprep.mubr.msk.f32.mxu1 %vm5836_vm0, %v5835_v15 }
 0x392   : > { %4839 = vmatmul.mubr.f32.gmra.mrb[56].mxu0 %v7502_v31 }
 0x393   : > { %4841 = vmatprep.mubr.msk.f32.mxu0 %vm5836_vm0, %v5835_v15 }
 0x394   : > { %4503 = vmatmul.mubr.f32.gmra.mrb[56].mxu1 %v7503_v55 }
 0x395   : > { %4505 = vmatprep.mubr.msk.f32.mxu1 %vm5836_vm0, %v5835_v15 }
 0x396   : > { %4842 = vmatmul.mubr.f32.gmra.mrb[58].mxu0 %v7504_v37 }
 0x397   : > { %4844 = vmatprep.mubr.msk.f32.mxu0 %vm5836_vm0, %v5835_v15 }
 0x398   : > { %4506 = vmatmul.mubr.f32.gmra.mrb[58].mxu1 %v7505_v58 }
 0x399   : > { %4508 = vmatprep.mubr.msk.f32.mxu1 %vm5836_vm0, %v5835_v15 }
 0x39a   : > { %4845 = vmatmul.mubr.f32.gmra.mrb[60].mxu0 %v7506_v35 }
 0x39b   : > { %4847 = vmatprep.mubr.msk.f32.mxu0 %vm5836_vm0, %v5835_v15 }
 0x39c   : > { %4509 = vmatmul.mubr.f32.gmra.mrb[60].mxu1 %v7507_v62 }
 0x39d   : > { %4511 = vmatprep.mubr.msk.f32.mxu1 %vm5836_vm0, %v5835_v15 }
 0x39e   : > { %4848 = vmatmul.mubr.f32.gmra.mrb[62].mxu0 %v7508_v23 }
 0x39f   : > { %4850 = vmatprep.mubr.msk.f32.mxu0 %vm5836_vm0, %v5835_v15 }
 0x3a0   : > { %4512 = vmatmul.mubr.f32.gmra.mrb[62].mxu1 %v7509_v40 }
 0x3a1   : > { %4514 = vmatprep.mubr.msk.f32.mxu1 %vm5836_vm0, %v5835_v15 }
 0x3a2   : > { %4851 = vmatmul.mubr.f32.gmra.mrb[64].mxu0 %v7510_v16 }
 0x3a3   : > { %4853 = vmatprep.mubr.msk.f32.mxu0 %vm5836_vm0, %v5835_v15 }
 0x3a4   : > { %4515 = vmatmul.mubr.f32.gmra.mrb[64].mxu1 %v7511_v29 }
 0x3a5   : > { %4517 = vmatprep.mubr.msk.f32.mxu1 %vm5836_vm0, %v5835_v15 }
 0x3a6   : > { %4854 = vmatmul.mubr.f32.gmra.mrb[66].mxu0 %v7512_v60 }
 0x3a7   : > { %4856 = vmatprep.mubr.msk.f32.mxu0 %vm5836_vm0, %v5835_v15 }
 0x3a8   : > { %4518 = vmatmul.mubr.f32.gmra.mrb[66].mxu1 %v1592_v53 }
 0x3a9   : > { %4520 = vmatprep.mubr.msk.f32.mxu1 %vm5836_vm0, %v5835_v15 }
 0x3aa   : > { %4857 = vmatmul.mubr.f32.gmra.mrb[68].mxu0 %v2551_v48 }
 0x3ab   : > { %4861 = vmatprep.mubr.msk.f32.mxu0 %vm5836_vm0, %v5835_v15 }
 0x3ac   : > { %4521 = vmatmul.mubr.f32.gmra.mrb[68].mxu1 %v1602_v43 }
 0x3ad   : > { %4525 = vmatprep.mubr.msk.f32.mxu1 %vm5836_vm0, %v5835_v15 }
 0x3ae   : > { %4862 = vmatmul.mubr.f32.vlgmr.msra.gmra.mrb[44].mxu0 %v6553_v33 }
 0x3af   : > { %5100 = vmatpush3.bf16.msra.mxu0 %v7489_v49  ;;  %4864 = vmatprep.mubr.msk.f32.mxu0 %vm5836_vm0, %v5835_v15 }
 0x3b0   : > { %4526 = vmatmul.mubr.f32.vlgmr.msra.gmra.mrb[44].mxu1 %v6556_v2  ;;  %5101 = vmatprep.subr.bf16.mxu0 %v5833_v0 }
 0x3b1   : > { %5052 = vmatpush3.bf16.msra.mxu1 %v7489_v49  ;;  %4528 = vmatprep.mubr.msk.f32.mxu1 %vm5836_vm0, %v5835_v15 }
 0x3b2   : > { %4865 = vmatmul.mubr.f32.gmra.mrb[46].mxu0 %v6566_v21  ;;  %5053 = vmatprep.subr.bf16.mxu1 %v5833_v0 }
 0x3b3   : > { %4867 = vmatprep.mubr.msk.f32.mxu0 %vm5836_vm0, %v5835_v15  ;;  %5102 = vmatpush3.bf16.msra.mxu0 %v7489_v49 }
 0x3b4   : > { %4529 = vmatmul.mubr.f32.gmra.mrb[46].mxu1 %v6572_v6  ;;  %5103 = vmatprep.subr.bf16.mxu0 %v5833_v0 }
 0x3b5   : > { %4531 = vmatprep.mubr.msk.f32.mxu1 %vm5836_vm0, %v5835_v15  ;;  %5054 = vmatpush3.bf16.msra.mxu1 %v7489_v49 }
 0x3b6   : > { %4868 = vmatmul.mubr.f32.gmra.mrb[48].mxu0 %v6586_v14  ;;  %5055 = vmatprep.subr.bf16.mxu1 %v5833_v0 }
 0x3b7   : > { %4870 = vmatprep.mubr.msk.f32.mxu0 %vm5836_vm0, %v5835_v15  ;;  %5104 = vmatpush3.bf16.msra.mxu0 %v7489_v49 }
 0x3b8   : > { %4532 = vmatmul.mubr.f32.gmra.mrb[48].mxu1 %v6594_v5  ;;  %5105 = vmatprep.subr.bf16.mxu0 %v5833_v0 }
 0x3b9   : > { %4534 = vmatprep.mubr.msk.f32.mxu1 %vm5836_vm0, %v5835_v15  ;;  %5056 = vmatpush3.bf16.msra.mxu1 %v7489_v49 }
 0x3ba   : > { %4871 = vmatmul.mubr.f32.gmra.mrb[50].mxu0 %v6602_v8  ;;  %5057 = vmatprep.subr.bf16.mxu1 %v5833_v0 }
 0x3bb   : > { %4873 = vmatprep.mubr.msk.f32.mxu0 %vm5836_vm0, %v5835_v15  ;;  %5106 = vmatpush3.bf16.msra.mxu0 %v7489_v49 }
 0x3bc   : > { %4535 = vmatmul.mubr.f32.gmra.mrb[50].mxu1 %v6616_v41  ;;  %5107 = vmatprep.subr.bf16.mxu0 %v5833_v0 }
 0x3bd   : > { %4537 = vmatprep.mubr.msk.f32.mxu1 %vm5836_vm0, %v5835_v15  ;;  %5058 = vmatpush3.bf16.msra.mxu1 %v7489_v49 }
 0x3be   : > { %4874 = vmatmul.mubr.f32.gmra.mrb[52].mxu0 %v6632_v52  ;;  %5059 = vmatprep.subr.bf16.mxu1 %v5833_v0 }
 0x3bf   : > { %4876 = vmatprep.mubr.msk.f32.mxu0 %vm5836_vm0, %v5835_v15  ;;  %5108 = vmatpush3.bf16.msra.mxu0 %v7489_v49 }
 0x3c0   : > { %4538 = vmatmul.mubr.f32.gmra.mrb[52].mxu1 %v6641_v11  ;;  %5109 = vmatprep.subr.bf16.mxu0 %v5833_v0 }
 0x3c1   : > { %4540 = vmatprep.mubr.msk.f32.mxu1 %vm5836_vm0, %v5835_v15  ;;  %5060 = vmatpush3.bf16.msra.mxu1 %v7489_v49 }
 0x3c2   : > { %4877 = vmatmul.mubr.f32.gmra.mrb[54].mxu0 %v6654_v22  ;;  %5061 = vmatprep.subr.bf16.mxu1 %v5833_v0 }
 0x3c3   : > { %4879 = vmatprep.mubr.msk.f32.mxu0 %vm5836_vm0, %v5835_v15  ;;  %5110 = vmatpush3.bf16.msra.mxu0 %v7489_v49 }
 0x3c4   : > { %4541 = vmatmul.mubr.f32.gmra.mrb[54].mxu1 %v6663_v32  ;;  %5111 = vmatprep.subr.bf16.mxu0 %v5833_v0 }
 0x3c5   : > { %4543 = vmatprep.mubr.msk.f32.mxu1 %vm5836_vm0, %v5835_v15  ;;  %5062 = vmatpush3.bf16.msra.mxu1 %v7489_v49 }
 0x3c6   : > { %4880 = vmatmul.mubr.f32.gmra.mrb[56].mxu0 %v6678_v20  ;;  %5063 = vmatprep.subr.bf16.mxu1 %v5833_v0 }
 0x3c7   : > { %4882 = vmatprep.mubr.msk.f32.mxu0 %vm5836_vm0, %v5835_v15  ;;  %5112 = vmatpush3.bf16.msra.mxu0 %v7489_v49 }
 0x3c8   : > { %4544 = vmatmul.mubr.f32.gmra.mrb[56].mxu1 %v6687_v44  ;;  %5113 = vmatprep.subr.bf16.mxu0 %v5833_v0 }
 0x3c9   : > { %4546 = vmatprep.mubr.msk.f32.mxu1 %vm5836_vm0, %v5835_v15  ;;  %5064 = vmatpush3.bf16.msra.mxu1 %v7489_v49 }
 0x3ca   : > { %4883 = vmatmul.mubr.f32.gmra.mrb[58].mxu0 %v6702_v3  ;;  %5065 = vmatprep.subr.bf16.mxu1 %v5833_v0  ;;  %v3354_v0 = vlaneseq }
 0x3cb   : > { %4885 = vmatprep.mubr.msk.f32.mxu0 %vm5836_vm0, %v5835_v15  ;;  %5114 = vmatpush3.bf16.msra.mxu0 %v7489_v49 }
 0x3cc   : > { %4547 = vmatmul.mubr.f32.gmra.mrb[58].mxu1 %v6711_v24 }
 0x3cd   : > { %4549 = vmatprep.mubr.msk.f32.mxu1 %vm5836_vm0, %v5835_v15  ;;  %5066 = vmatpush3.bf16.msra.mxu1 %v7489_v49 }
 0x3ce   : > { %4886 = vmatmul.mubr.f32.gmra.mrb[60].mxu0 %v6726_v56 }
 0x3cf   : > { %4888 = vmatprep.mubr.msk.f32.mxu0 %vm5836_vm0, %v5835_v15 }
 0x3d0   : > { %4550 = vmatmul.mubr.f32.gmra.mrb[60].mxu1 %v6735_v51 }
 0x3d1   : > { %4552 = vmatprep.mubr.msk.f32.mxu1 %vm5836_vm0, %v5835_v15 }
 0x3d2   : > { %4889 = vmatmul.mubr.f32.gmra.mrb[62].mxu0 %v6750_v38 }
 0x3d3   : > { %4891 = vmatprep.mubr.msk.f32.mxu0 %vm5836_vm0, %v5835_v15 }
 0x3d4   : > { %4553 = vmatmul.mubr.f32.gmra.mrb[62].mxu1 %v6759_v4 }
 0x3d5   : > { %4555 = vmatprep.mubr.msk.f32.mxu1 %vm5836_vm0, %v5835_v15 }
 0x3d6   : > { %4892 = vmatmul.mubr.f32.gmra.mrb[64].mxu0 %v6774_v19 }
 0x3d7   : > { %4894 = vmatprep.mubr.msk.f32.mxu0 %vm5836_vm0, %v5835_v15 }
 0x3d8   : > { %4556 = vmatmul.mubr.f32.gmra.mrb[64].mxu1 %v6783_v39 }
 0x3d9   : > { %4558 = vmatprep.mubr.msk.f32.mxu1 %vm5836_vm0, %v5835_v15 }
 0x3da   : > { %4895 = vmatmul.mubr.f32.gmra.mrb[66].mxu0 %v6798_v50 }
 0x3db   : > { %4897 = vmatprep.mubr.msk.f32.mxu0 %vm5836_vm0, %v5835_v15 }
 0x3dc   : > { %4559 = vmatmul.mubr.f32.gmra.mrb[66].mxu1 %v6807_v54 }
 0x3dd   : > { %4561 = vmatprep.mubr.msk.f32.mxu1 %vm5836_vm0, %v5835_v15 }
 0x3de   : > { %4898 = vmatmul.mubr.f32.gmra.mrb[68].mxu0 %v6822_v1 }
 0x3df   : > { %4932 = vmatprep.mubr.msk.f32.mxu0 %vm5836_vm0, %v5835_v15 }
 0x3e0   : > { %4562 = vmatmul.mubr.f32.gmra.mrb[68].mxu1 %v6830_v61 }
 0x3e1   : > { %4596 = vmatprep.mubr.msk.f32.mxu1 %vm5836_vm0, %v5835_v15 }
 0x3e2   : > { %4933 = vmatmul.mubr.f32.vlgmr.msra.gmra.mrb[44].mxu0 %v6553_v33  ;;  %v7350_v33 = vshrl.u32 %v3354_v0, 7 }
 0x3e3   : > { %4935 = vmatprep.mubr.msk.f32.mxu0 %vm5836_vm0, %v5835_v15 }
 0x3e4   : > { %4597 = vmatmul.mubr.f32.vlgmr.msra.gmra.mrb[44].mxu1 %v6556_v2  ;;  %v7352_v2 = vstv %s3353_s21  ;;  %v3356_v7 = vadd.s32 8, %v7350_v33  ;;  %v3359_v53 = vadd.s32 32, %v7350_v33  ;;  %v3360_v10 = vadd.s32 40, %v7350_v33 }
 0x3e5   : > { %4599 = vmatprep.mubr.msk.f32.mxu1 %vm5836_vm0, %v5835_v15  ;;  %v3361_v23 = vadd.s32 48, %v7350_v33 }
 0x3e6   : > { %4936 = vmatmul.mubr.f32.gmra.mrb[46].mxu0 %v6566_v21  ;;  %v3373_v27 = vadd.s32 %v7352_v2, %v3359_v53  ;;  %v3374_v62 = vadd.s32 %v7352_v2, %v3360_v10 }
 0x3e7   : > { %4938 = vmatprep.mubr.msk.f32.mxu0 %vm5836_vm0, %v5835_v15 }
 0x3e8   : > { %4600 = vmatmul.mubr.f32.gmra.mrb[46].mxu1 %v6572_v6  ;;  %vm3386_vm6 = vcmp.lt.s32.totalorder %v3373_v27, 100  ;;  %vm3387_vm7 = vcmp.lt.s32.totalorder %v3374_v62, 100 }
 0x3e9   : > { %4602 = vmatprep.mubr.msk.f32.mxu1 %vm5836_vm0, %v5835_v15 }
 0x3ea   : > { %4939 = vmatmul.mubr.f32.gmra.mrb[48].mxu0 %v6586_v14 }
 0x3eb   : > { %4941 = vmatprep.mubr.msk.f32.mxu0 %vm5836_vm0, %v5835_v15 }
 0x3ec   : > { %4603 = vmatmul.mubr.f32.gmra.mrb[48].mxu1 %v6594_v5  ;;  %v3369_v5 = vadd.s32 %v7352_v2, %v7350_v33 }
 0x3ed   : > { %4605 = vmatprep.mubr.msk.f32.mxu1 %vm5836_vm0, %v5835_v15 }
 0x3ee   : > { %4942 = vmatmul.mubr.f32.gmra.mrb[50].mxu0 %v6602_v8  ;;  %vm3382_vm1 = vcmp.lt.s32.totalorder %v3369_v5, 100 }
 0x3ef   : > { %4944 = vmatprep.mubr.msk.f32.mxu0 %vm5836_vm0, %v5835_v15 }
 0x3f0   : > { %4606 = vmatmul.mubr.f32.gmra.mrb[50].mxu1 %v6616_v41 }
 0x3f1   : > { %4608 = vmatprep.mubr.msk.f32.mxu1 %vm5836_vm0, %v5835_v15 }
 0x3f2   : > { %4945 = vmatmul.mubr.f32.gmra.mrb[52].mxu0 %v6632_v52  ;;  %v3370_v52 = vadd.s32 %v7352_v2, %v3356_v7 }
 0x3f3   : > { %4947 = vmatprep.mubr.msk.f32.mxu0 %vm5836_vm0, %v5835_v15 }
 0x3f4   : > { %4609 = vmatmul.mubr.f32.gmra.mrb[52].mxu1 %v6641_v11  ;;  %vm3383_vm2 = vcmp.lt.s32.totalorder %v3370_v52, 100 }
 0x3f5   : > { %4611 = vmatprep.mubr.msk.f32.mxu1 %vm5836_vm0, %v5835_v15 }
 0x3f6   : > { %4948 = vmatmul.mubr.f32.gmra.mrb[54].mxu0 %v6654_v22 }
 0x3f7   : > { %4950 = vmatprep.mubr.msk.f32.mxu0 %vm5836_vm0, %v5835_v15 }
 0x3f8   : > { %4612 = vmatmul.mubr.f32.gmra.mrb[54].mxu1 %v6663_v32 }
 0x3f9   : > { %4614 = vmatprep.mubr.msk.f32.mxu1 %vm5836_vm0, %v5835_v15 }
 0x3fa   : > { %4951 = vmatmul.mubr.f32.gmra.mrb[56].mxu0 %v6678_v20 }
 0x3fb   : > { %4953 = vmatprep.mubr.msk.f32.mxu0 %vm5836_vm0, %v5835_v15 }
 0x3fc   : > { %4615 = vmatmul.mubr.f32.gmra.mrb[56].mxu1 %v6687_v44 }
 0x3fd   : > { %4617 = vmatprep.mubr.msk.f32.mxu1 %vm5836_vm0, %v5835_v15 }
 0x3fe   : > { %4954 = vmatmul.mubr.f32.gmra.mrb[58].mxu0 %v6702_v3 }
 0x3ff   : > { %4956 = vmatprep.mubr.msk.f32.mxu0 %vm5836_vm0, %v5835_v15 }
 0x400   : > { %4618 = vmatmul.mubr.f32.gmra.mrb[58].mxu1 %v6711_v24 }
 0x401   : > { %4620 = vmatprep.mubr.msk.f32.mxu1 %vm5836_vm0, %v5835_v15 }
 0x402   : > { %4957 = vmatmul.mubr.f32.gmra.mrb[60].mxu0 %v6726_v56  ;;  %v3358_v56 = vadd.s32 24, %v7350_v33 }
 0x403   : > { %4959 = vmatprep.mubr.msk.f32.mxu0 %vm5836_vm0, %v5835_v15 }
 0x404   : > { %4621 = vmatmul.mubr.f32.gmra.mrb[60].mxu1 %v6735_v51  ;;  %v3372_v63 = vadd.s32 %v7352_v2, %v3358_v56 }
 0x405   : > { %4623 = vmatprep.mubr.msk.f32.mxu1 %vm5836_vm0, %v5835_v15 }
 0x406   : > { %4960 = vmatmul.mubr.f32.gmra.mrb[62].mxu0 %v6750_v38  ;;  %vm3385_vm5 = vcmp.lt.s32.totalorder %v3372_v63, 100 }
 0x407   : > { %4962 = vmatprep.mubr.msk.f32.mxu0 %vm5836_vm0, %v5835_v15 }
 0x408   : > { %4624 = vmatmul.mubr.f32.gmra.mrb[62].mxu1 %v6759_v4 }
 0x409   : > { %4626 = vmatprep.mubr.msk.f32.mxu1 %vm5836_vm0, %v5835_v15 }
 0x40a   : > { %4963 = vmatmul.mubr.f32.gmra.mrb[64].mxu0 %v6774_v19 }
 0x40b   : > { %4965 = vmatprep.mubr.msk.f32.mxu0 %vm5836_vm0, %v5835_v15 }
 0x40c   : > { %4627 = vmatmul.mubr.f32.gmra.mrb[64].mxu1 %v6783_v39 }
 0x40d   : > { %4629 = vmatprep.mubr.msk.f32.mxu1 %vm5836_vm0, %v5835_v15 }
 0x40e   : > { %4966 = vmatmul.mubr.f32.gmra.mrb[66].mxu0 %v6798_v50 }
 0x40f   : > { %4968 = vmatprep.mubr.msk.f32.mxu0 %vm5836_vm0, %v5835_v15 }
 0x410   : > { %4630 = vmatmul.mubr.f32.gmra.mrb[66].mxu1 %v6807_v54 }
 0x411   : > { %4632 = vmatprep.mubr.msk.f32.mxu1 %vm5836_vm0, %v5835_v15  ;;  %v3357_v15 = vadd.s32 16, %v7350_v33 }
 0x412   : > { %4969 = vmatmul.mubr.f32.gmra.mrb[68].mxu0 %v6822_v1 }
 0x413   : > { %v3371_v32 = vadd.s32 %v7352_v2, %v3357_v15  ;;  %v3375_v15 = vadd.s32 %v7352_v2, %v3361_v23 }
 0x414   : > { %4633 = vmatmul.mubr.f32.gmra.mrb[68].mxu1 %v6830_v61 }
 0x415   : > { %vm3384_vm4 = vcmp.lt.s32.totalorder %v3371_v32, 100  ;;  %vm3388_vm8 = vcmp.lt.s32.totalorder %v3375_v15, 100 }
 0x4b5   : > { %v3237_v21 = vpop.f32.mrb[44].mxu0 }
 0x4b6   : > { %v4934_v6 = vpop.f32.mrb[45].mxu0  ;;  %v3326_v8 = vmul.f32 0.00078125, %v3237_v21 }
 0x4b7   : > { %v2288_v14 = vpop.f32.mrb[44].mxu1 }
 0x4b8   : > { %v3313_v1 = vmul.f32 0.9, %v2288_v14  ;;  %v4598_v41 = vpop.f32.mrb[45].mxu1 }
 0x4b9   : > { %v3243_v47 = vpop.f32.mrb[46].mxu0 }
 0x4ba   : > { %v3339_v11 = vadd.f32 %v3326_v8, %v3313_v1  ;;  %v4937_v39 = vpop.f32.mrb[47].mxu0  ;;  %v3327_v20 = vmul.f32 0.00078125, %v3243_v47  ;;  %v3362_v8 = vadd.s32 56, %v7350_v33 }
 0x4bb   : > { %v2294_v22 = vpop.f32.mrb[46].mxu1 }
 0x4bc   : > { %v3314_v44 = vmul.f32 0.9, %v2294_v22  ;;  %v4601_v3 = vpop.f32.mrb[47].mxu1  ;;  %v3395_v4 = vsel %vm3382_vm1, %v3339_v11, 0.0 }
 0x4bd   : > { %v3249_v24 = vpop.f32.mrb[48].mxu0  ;;  %v3410_v17 = vsel %vm3409_vm3, %v3395_v4, 0.0  ;;  %v3376_v3 = vadd.s32 %v7352_v2, %v3362_v8 }
 0x4be   : > { %v3340_v51 = vadd.f32 %v3327_v20, %v3314_v44  ;;  %v4940_v45 = vpop.f32.mrb[49].mxu0  ;;  %v3328_v54 = vmul.f32 0.00078125, %v3249_v24  ;;  %v3363_v24 = vadd.s32 64, %v7350_v33 }
 0x4bf   : > { %v2300_v38 = vpop.f32.mrb[48].mxu1  ;;  %vm3389_vm9 = vcmp.lt.s32.totalorder %v3376_v3, 100 }
 0x4c0   : > { %v3396_v19 = vsel %vm3383_vm2, %v3340_v51, 0.0  ;;  %v3315_v59 = vmul.f32 0.9, %v2300_v38  ;;  %v4604_v50 = vpop.f32.mrb[49].mxu1 }
 0x4c1   : > { %v3411_v43 = vsel %vm3409_vm3, %v3396_v19, 0.0  ;;  %v3255_v61 = vpop.f32.mrb[50].mxu0 }
 0x4c2   : > { %v3412_v46 = vadd.f32 %v3411_v43, %v3410_v17  ;;  %v3341_v48 = vadd.f32 %v3328_v54, %v3315_v59  ;;  %v4943_v36 = vpop.f32.mrb[51].mxu0  ;;  %v3329_v13 = vmul.f32 0.00078125, %v3255_v61  ;;  %v3377_v43 = vadd.s32 %v7352_v2, %v3363_v24 }
 0x4c3   : > { %v2306_v57 = vpop.f32.mrb[50].mxu1  ;;  %v3364_v61 = vadd.s32 72, %v7350_v33 }
 0x4c4   : > { %v3397_v49 = vsel %vm3384_vm4, %v3341_v48, 0.0  ;;  %v3316_v28 = vmul.f32 0.9, %v2306_v57  ;;  %v4607_v42 = vpop.f32.mrb[51].mxu1  ;;  %vm3390_vm10 = vcmp.lt.s32.totalorder %v3377_v43, 100 }
 0x4c5   : > { %v3413_v18 = vsel %vm3409_vm3, %v3397_v49, 0.0  ;;  %v3261_v30 = vpop.f32.mrb[52].mxu0 }
 0x4c6   : > { %v3414_v26 = vadd.f32 %v3413_v18, %v3412_v46  ;;  %v3342_v12 = vadd.f32 %v3329_v13, %v3316_v28  ;;  %v4946_v25 = vpop.f32.mrb[53].mxu0  ;;  %v3330_v31 = vmul.f32 0.00078125, %v3261_v30  ;;  %v3378_v18 = vadd.s32 %v7352_v2, %v3364_v61 }
 0x4c7   : > { %v2312_v34 = vpop.f32.mrb[52].mxu1  ;;  %v3365_v30 = vadd.s32 80, %v7350_v33 }
 0x4c8   : > { %v3398_v9 = vsel %vm3385_vm5, %v3342_v12, 0.0  ;;  %v3317_v55 = vmul.f32 0.9, %v2312_v34  ;;  %v4610_v37 = vpop.f32.mrb[53].mxu1  ;;  %vm3391_vm11 = vcmp.lt.s32.totalorder %v3378_v18, 100 }
 0x4c9   : > { %v3415_v58 = vsel %vm3409_vm3, %v3398_v9, 0.0  ;;  %v3267_v35 = vpop.f32.mrb[54].mxu0 }
 0x4ca   : > { %v3416_v40 = vadd.f32 %v3415_v58, %v3414_v26  ;;  %v3343_v16 = vadd.f32 %v3330_v31, %v3317_v55  ;;  %v4949_v29 = vpop.f32.mrb[55].mxu0  ;;  %v3331_v21 = vmul.f32 0.00078125, %v3267_v35  ;;  %v3379_v58 = vadd.s32 %v7352_v2, %v3365_v30 }
 0x4cb   : > { %v2318_v60 = vpop.f32.mrb[54].mxu1  ;;  %v3366_v35 = vadd.s32 88, %v7350_v33 }
 0x4cc   : > { %v3399_v0 = vsel %vm3386_vm6, %v3343_v16, 0.0  ;;  %v3318_v7 = vmul.f32 0.9, %v2318_v60  ;;  %v4613_v6 = vpop.f32.mrb[55].mxu1  ;;  %vm3392_vm12 = vcmp.lt.s32.totalorder %v3379_v58, 100 }
 0x4cd   : > { %v3417_v14 = vsel %vm3409_vm3, %v3399_v0, 0.0  ;;  %v3273_v5 = vpop.f32.mrb[56].mxu0 }
 0x4ce   : > { %v3418_v1 = vadd.f32 %v3417_v14, %v3416_v40  ;;  %v3344_v41 = vadd.f32 %v3331_v21, %v3318_v7  ;;  %v4952_v47 = vpop.f32.mrb[57].mxu0  ;;  %v3332_v39 = vmul.f32 0.00078125, %v3273_v5  ;;  %v3380_v14 = vadd.s32 %v7352_v2, %v3366_v35 }
 0x4cf   : > { %v2324_v52 = vpop.f32.mrb[56].mxu1  ;;  %v3367_v5 = vadd.s32 96, %v7350_v33 }
 0x4d0   : > { %v3400_v11 = vsel %vm3387_vm7, %v3344_v41, 0.0  ;;  %v3319_v22 = vmul.f32 0.9, %v2324_v52  ;;  %v4616_v32 = vpop.f32.mrb[57].mxu1  ;;  %vm3393_vm13 = vcmp.lt.s32.totalorder %v3380_v14, 100 }
 0x4d1   : > { %v3419_v20 = vsel %vm3409_vm3, %v3400_v11, 0.0  ;;  %v3279_v44 = vpop.f32.mrb[58].mxu0 }
 0x4d2   : > { %v3420_v56 = vadd.f32 %v3419_v20, %v3418_v1  ;;  %v3345_v4 = vadd.f32 %v3332_v39, %v3319_v22  ;;  %v4955_v51 = vpop.f32.mrb[59].mxu0  ;;  %v3333_v19 = vmul.f32 0.00078125, %v3279_v44  ;;  %v3381_v20 = vadd.s32 %v7352_v2, %v3367_v5 }
 0x4d3   : > { %v2330_v45 = vpop.f32.mrb[58].mxu1 }
 0x4d4   : > { %v3401_v38 = vsel %vm3388_vm8, %v3345_v4, 0.0  ;;  %v3320_v54 = vmul.f32 0.9, %v2330_v45  ;;  %v4619_v59 = vpop.f32.mrb[59].mxu1  ;;  %vm3394_vm14 = vcmp.lt.s32.totalorder %v3381_v20, 100 }
 0x4d5   : > { %v3421_v50 = vsel %vm3409_vm3, %v3401_v38, 0.0  ;;  %v3285_v17 = vpop.f32.mrb[60].mxu0 }
 0x4d6   : > { %v3422_v63 = vadd.f32 %v3421_v50, %v3420_v56  ;;  %v3346_v53 = vadd.f32 %v3333_v19, %v3320_v54  ;;  %v4958_v46 = vpop.f32.mrb[61].mxu0  ;;  %v3334_v57 = vmul.f32 0.00078125, %v3285_v17 }
 0x4d7   : > { %v2336_v48 = vpop.f32.mrb[60].mxu1 }
 0x4d8   : > { %v3402_v36 = vsel %vm3389_vm9, %v3346_v53, 0.0  ;;  %v3321_v49 = vmul.f32 0.9, %v2336_v48  ;;  %v4622_v13 = vpop.f32.mrb[61].mxu1 }
 0x4d9   : > { %v3423_v28 = vsel %vm3409_vm3, %v3402_v36, 0.0  ;;  %v3291_v42 = vpop.f32.mrb[62].mxu0 }
 0x4da   : > { %v3424_v27 = vadd.f32 %v3423_v28, %v3422_v63  ;;  %v3347_v10 = vadd.f32 %v3334_v57, %v3321_v49  ;;  %v4961_v26 = vpop.f32.mrb[63].mxu0  ;;  %v3335_v34 = vmul.f32 0.00078125, %v3291_v42 }
 0x4db   : > { %v2342_v12 = vpop.f32.mrb[62].mxu1 }
 0x4dc   : > { %v3403_v25 = vsel %vm3390_vm10, %v3347_v10, 0.0  ;;  %v3322_v9 = vmul.f32 0.9, %v2342_v12  ;;  %v4625_v31 = vpop.f32.mrb[63].mxu1 }
 0x4dd   : > { %v3425_v55 = vsel %vm3409_vm3, %v3403_v25, 0.0  ;;  %v3297_v37 = vpop.f32.mrb[64].mxu0 }
 0x4de   : > { %v3426_v62 = vadd.f32 %v3425_v55, %v3424_v27  ;;  %v3348_v23 = vadd.f32 %v3335_v34, %v3322_v9  ;;  %v4964_v40 = vpop.f32.mrb[65].mxu0  ;;  %v3336_v60 = vmul.f32 0.00078125, %v3297_v37 }
 0x4df   : > { %v2348_v16 = vpop.f32.mrb[64].mxu1 }
 0x4e0   : > { %v3404_v29 = vsel %vm3391_vm11, %v3348_v23, 0.0  ;;  %v3323_v0 = vmul.f32 0.9, %v2348_v16  ;;  %v4628_v21 = vpop.f32.mrb[65].mxu1 }
 0x4e1   : > { %v3427_v7 = vsel %vm3409_vm3, %v3404_v29, 0.0  ;;  %v3303_v6 = vpop.f32.mrb[66].mxu0 }
 0x4e2   : > { %v3428_v15 = vadd.f32 %v3427_v7, %v3426_v62  ;;  %v3349_v8 = vadd.f32 %v3336_v60, %v3323_v0  ;;  %v4967_v1 = vpop.f32.mrb[67].mxu0  ;;  %v3337_v52 = vmul.f32 0.00078125, %v3303_v6 }
 0x4e3   : > { %v2354_v41 = vpop.f32.mrb[66].mxu1 }
 0x4e4   : > { %v3405_v47 = vsel %vm3392_vm12, %v3349_v8, 0.0  ;;  %v3324_v11 = vmul.f32 0.9, %v2354_v41  ;;  %v4631_v39 = vpop.f32.mrb[67].mxu1 }
 0x4e5   : > { %v3429_v22 = vsel %vm3409_vm3, %v3405_v47, 0.0  ;;  %v3309_v32 = vpop.f32.mrb[68].mxu0 }
 0x4e6   : > { %v3350_v44 = vadd.f32 %v3337_v52, %v3324_v11  ;;  %v4970_v3 = vpop.f32.mrb[69].mxu0  ;;  %v3430_v24 = vadd.f32 %v3429_v22, %v3428_v15  ;;  %v3338_v33 = vmul.f32 0.00078125, %v3309_v32 }
 0x4e7   : > { %v2360_v56 = vpop.f32.mrb[68].mxu1 }
 0x4e8   : > { %v3406_v4 = vsel %vm3393_vm13, %v3350_v44, 0.0  ;;  %v3325_v51 = vmul.f32 0.9, %v2360_v56  ;;  %v4634_v45 = vpop.f32.mrb[69].mxu1 }
 0x4e9   : > { %v3431_v38 = vsel %vm3409_vm3, %v3406_v4, 0.0 }
 0x4ea   : > { %v3351_v19 = vadd.f32 %v3338_v33, %v3325_v51  ;;  %v3432_v54 = vadd.f32 %v3431_v38, %v3430_v24 }
 0x4ec   : > { %v3407_v59 = vsel %vm3394_vm14, %v3351_v19, 0.0 }
 0x4ed   : > { %v3433_v50 = vsel %vm3409_vm3, %v3407_v59, 0.0 }
 0x4ee   : > { %v3434_v17 = vadd.f32 %v3433_v50, %v3432_v54 }
 0x4f0   : > { %3435 = vadd.xlane.f32.xlu1 %v3434_v17 }
 0x57d   : > { %v3436_v2 = vpop.xlane.xlu1 %3435 }
 0x57e   : > { %v3437_v43 = vrot.slane %v3436_v2, 4 }
 0x580   : > { %v3438_v61 = vadd.f32 %v3437_v43, %v3436_v2 }
 0x582   : > { %v3439_v63 = vrot.slane %v3438_v61, 2 }
 0x584   : > { %v3440_v53 = vadd.f32 %v3439_v63, %v3438_v61 }
 0x586   : > { %v3441_v46 = vrot.slane %v3440_v53, 1 }
 0x588   : > { %v3442_v48 = vadd.f32 %v3441_v46, %v3440_v53 }
 0x58a   : > { %5493 = vpush %v3442_v48 }
 0x5bb   : > { %s5494_s12 = spop %5493 }
 0x5bc   : > { %v3444_v36 = vstv %s5494_s12 }
 0x5bd   : > { %3446 = vst [vmem:[%s231_s3] sm:$0xff] %v3444_v36 }
 0x5be   : > { %5733 = shalt.err (!%p5730_p4)
}
 0x5bf   : > { %s5734_s7 = scalar_lea.hbm %s7398_s23, 128  ;;  %s5738_s21 = scalar_lea.hbm %s7453_s2, 256 }
 0x5c0   : > { %p5735_p13 = scmp.ne.s32.totalorder %s7398_s23, %s5734_s7  ;;  %p5739_p12 = scmp.lt.u32.totalorder %s7398_s23, %s7453_s2 }
 0x5c1   : > { %p5740_p0 = scmp.lt.u32.totalorder %s5738_s21, %s5734_s7  ;;  %p5742_p2 = scmp.lt.u32.totalorder %s5734_s7, %s7398_s23 }
 0x5c2   : > { %p5736_p7 = pnand %p5735_p13, %p7513_p8 }
 0x5c3   : > { %p5741_p5 = por %p5740_p0, %p5739_p12 }
 0x5c4   : > { %p5737_p6 = pneg %p5736_p7 }
 0x5c5   : > { %p5743_p9 = por %p5742_p2, %p5741_p5 }
 0x5c7   : > { %p5744_p10 = pnand %p5743_p9, %p5737_p6 }
 0x5c9   : > { %5747 = shalt.err (!%p5744_p10)
}
 0x5ca   : > { %5499 = dma.vmem_to_hbm [thread:$0]  (%p7513_p8), %s7400_s29, 128, %s7398_s23, %s3448_s30  }
 0x5cb PF: > { %s3473_s28 = sand.u32 1, %s5799_s9   ;;  %p7514_p11 = scmp.ne.s32.totalorder %s7484_s26, 0 }
 0x5cc   : > { %p7515_p1 = scmp.ge.s32.totalorder %s5827_s16, 2  ;;  %s3474_s3 = scalar_lea.sflag [#allocation4], %s3473_s28 }
 0x5ce   : > { %p5509_p3 = pnand %p7515_p1, %p7514_p11 }
 0x5d0   : > { %5793 = dma.done.wait (!%p5509_p3), %s3474_s3, 128  }
 0x5d1   : > { %5795 = vsyncadd (!%p5509_p3), %s3474_s3, 4294967168  ;;  %s21_s16 = sadd.s32 1, %s5827_s16   ;;  %s7516_s9 = smov %s5803_s10 }
 0x5d2   : > { %p18_p4 = scmp.ge.s32.totalorder %s21_s16, 4   ;;  %s7517_s10 = smov %s5807_s11 }
 0x5d3   : > { %s7518_s11 = smov %s5912_s24  ;;  %s7519_s12 = smov %s5815_s13 }
 0x5d4   : > { %s7441_s13 = smov 0   ;;  %s7520_s14 = smov %s5823_s15 }
 0x5d5   : > { %s7521_s15 = smov %s7523_s19  ;;  %20 = sbr.rel (!%p18_p4) target bundleno = 9 (0x9), region = 90 }
 0x5dc   :  { %3479 = vsyncpa [#allocation3], 1 }
 0x5dd   :  { %3481 = vsyncpa [#allocation3 + $0x1], 1 }
 0x5de   :  { %3482 = vsyncpa [#allocation6], 1 }
 0x5df   :  { %3484 = vsyncpa [#allocation6 + $0x1], 1 }
 0x5e0   :  { %3485 = vsyncpa [#allocation4], 1 }
 0x5e1   :  { %3487 = vsyncpa [#allocation4 + $0x1], 1 }

</bundles_post_ra>
